<compile_context>
chip_gen: v6e
topology: v6e:2x2x1
jax: 0.10.0
libtpu: 0.0.40
codegen_flags: <defaults>
</compile_context>

<pallas_src>
import functools

import jax
import jax.numpy as jnp
from jax.experimental import pallas as pl
from jax.experimental.pallas import tpu as pltpu


def _round_up(x, m):
    return ((x + m - 1) // m) * m


# ----------------------------- Pallas kernel -------------------------------


def wn_kernel(
    audio_ref,      # (1, 1, n_in, W)   bf16  (windowed, halo included)
    spect_ref,      # (1, 1, n_mel, W)  bf16
    start_w_ref,    # (C, n_in)         bf16
    start_b_ref,    # (C, 1)            f32
    cond_w_ref,     # (L, 2C, n_mel)    bf16
    cond_b_ref,     # (L, 2C, 1)        f32
    in_w_ref,       # (L, 2C, K*C)      bf16  (taps packed along contraction)
    in_b_ref,       # (L, 2C, 1)        f32
    rs_w_ref,       # (L, 2C, C)        bf16  (last layer: rows [C:) unused)
    rs_b_ref,       # (L, 2C, 1)        f32
    end_w_ref,      # (2*n_in, C)       bf16
    end_b_ref,      # (2*n_in, 1)       f32
    out_ref,        # (1, 2*n_in, T_BLK) f32
    x_pad_ref,      # scratch: (C, pad + W + pad) bf16, zero-padded tap buffer
    *,
    n_layers: int,
    n_channels: int,
    kernel_size: int,
    t_blk: int,
    h_pad: int,
    pad: int,
    seq_len: int,
):
    C = n_channels
    K = kernel_size
    L = n_layers
    W = t_blk + 2 * h_pad

    j = pl.program_id(1)                       # time-tile index

    audio = audio_ref[0, 0]                    # (n_in, W)  bf16
    spect = spect_ref[0, 0]                    # (n_mel, W) bf16

    # Validity mask reproducing the global zero-padding semantics of the
    # dilated convs at the two ends of the sequence (computed once per step).
    p_idx = jax.lax.broadcasted_iota(jnp.int32, (1, W), 1)
    g_idx = p_idx + j * t_blk - h_pad          # global time index of column p
    valid = (g_idx >= 0) & (g_idx < seq_len)   # (1, W)

    # Zero the tap scratch (halo bands must be zero on every grid step).
    x_pad_ref[...] = jnp.zeros_like(x_pad_ref)

    # start: 1x1 conv (bf16 MXU, f32 accumulation)
    x = jnp.dot(start_w_ref[...], audio, preferred_element_type=jnp.float32)
    x = x + start_b_ref[...]                   # (C, W) f32

    output = jnp.zeros((C, t_blk), jnp.float32)

    for i in range(L):
        dilation = 2 ** i
        last = i == L - 1

        # Stage masked x into the zero-padded scratch (bf16 for the MXU).
        x_m = jnp.where(valid, x, 0.0).astype(x_pad_ref.dtype)
        x_pad_ref[:, pad:pad + W] = x_m

        if last:
            col0, ncol = pad + h_pad, t_blk    # only the core feeds the output
        else:
            col0, ncol = pad, W

        # Dilated conv: K shifted slice loads fused into one matmul with
        # contraction K*C (no roll / iota / where per tap).
        taps = [
            x_pad_ref[:, col0 + (k - K // 2) * dilation:
                         col0 + (k - K // 2) * dilation + ncol]
            for k in range(K)
        ]
        xs_all = jnp.concatenate(taps, axis=0)             # (K*C, ncol) bf16

        in_act = jnp.dot(in_w_ref[i], xs_all,
                         preferred_element_type=jnp.float32)
        in_act = in_act + in_b_ref[i]

        # Per-layer conditioning (never materialize the (2*C*L, T) buffer).
        sp = spect[:, h_pad:h_pad + t_blk] if last else spect
        cond_i = jnp.dot(cond_w_ref[i], sp,
                         preferred_element_type=jnp.float32)
        in_act = in_act + cond_i + cond_b_ref[i]

        # fused_add_tanh_sigmoid_multiply (f32 on VPU/EUP)
        acts = jnp.tanh(in_act[:C, :]) * jax.nn.sigmoid(in_act[C:, :])
        acts_bf = acts.astype(jnp.bfloat16)

        if not last:
            rs = jnp.dot(rs_w_ref[i], acts_bf,
                         preferred_element_type=jnp.float32)
            rs = rs + rs_b_ref[i]                            # (2C, W)
            x = x + rs[:C, :]
            output = output + rs[C:, h_pad:h_pad + t_blk]
        else:
            # Last layer: only C res/skip channels, only over the core.
            rs = jnp.dot(rs_w_ref[i, :C, :], acts_bf,
                         preferred_element_type=jnp.float32)
            output = output + rs + rs_b_ref[i, :C, :]

    # end: 1x1 conv
    y = jnp.dot(end_w_ref[...], output.astype(jnp.bfloat16),
                preferred_element_type=jnp.float32)
    y = y + end_b_ref[...]
    out_ref[0] = y.astype(out_ref.dtype)


# ------------------------------- wrapper ------------------------------------


def wn_forward(audio, spect, params, *, n_layers, n_channels, kernel_size,
               t_blk=128):
    assert kernel_size % 2 == 1
    assert n_channels % 2 == 0

    B, n_in, T = audio.shape
    _, n_mel, _ = spect.shape
    C, K, L = n_channels, kernel_size, n_layers

    (start_w, start_b, cond_w, cond_b,
     in_w, in_b, rs_w, rs_b, end_w, end_b) = params

    # Halo sizes.
    halo = (K // 2) * (2 ** L - 1)                 # total receptive-field halo
    h_pad = _round_up(halo, 128) if halo > 0 else 0      # lane-aligned halo
    max_shift = (K // 2) * (2 ** (L - 1))
    pad = _round_up(max_shift, 128) if max_shift > 0 else 0

    n_tiles = pl.cdiv(T, t_blk)
    t_grid = n_tiles * t_blk
    W = t_blk + 2 * h_pad

    # Zero-pad time (left h_pad, right up to grid + h_pad) and build
    # overlapping windows so each tile sees its halo.
    # TODO(synk): at production T, replace this wrapper-side window
    # materialization with a manual halo DMA (pl.ANY + make_async_copy) to
    # avoid the (W / t_blk)x input duplication.
    def pad_time(z):
        return jnp.pad(z, ((0, 0), (0, 0), (h_pad, t_grid - T + h_pad)))

    def windows(z):
        return jnp.stack(
            [z[:, :, j * t_blk:j * t_blk + W] for j in range(n_tiles)], axis=1)

    audio_w = windows(pad_time(audio)).astype(jnp.bfloat16)   # (B, nt, n_in, W)
    spect_w = windows(pad_time(spect)).astype(jnp.bfloat16)   # (B, nt, n_mel, W)

    kernel = functools.partial(
        wn_kernel,
        n_layers=L, n_channels=C, kernel_size=K,
        t_blk=t_blk, h_pad=h_pad, pad=pad, seq_len=T,
    )

    def const_spec(shape):
        nd = len(shape)
        return pl.BlockSpec(shape, lambda b, j, _nd=nd: (0,) * _nd)

    weights = (start_w, start_b, cond_w, cond_b,
               in_w, in_b, rs_w, rs_b, end_w, end_b)

    # Rough cost estimate (per call) for the XLA scheduler.
    flops_per_step = 2 * W * (C * n_in
                              + L * (2 * C * (K * C) + 2 * C * n_mel + 2 * C * C)) \
        + 2 * t_blk * (2 * n_in * C)
    bytes_accessed = int(audio_w.size + spect_w.size) * 2 \
        + sum(int(p.size) * p.dtype.itemsize for p in weights) \
        + B * t_grid * 2 * n_in * 4
    cost = pl.CostEstimate(
        flops=int(B * n_tiles * flops_per_step),
        transcendentals=int(B * n_tiles * L * 2 * C * W),
        bytes_accessed=int(bytes_accessed),
    )

    out = pl.pallas_call(
        kernel,
        out_shape=jax.ShapeDtypeStruct((B, 2 * n_in, t_grid), jnp.float32),
        grid=(B, n_tiles),
        in_specs=[
            pl.BlockSpec((1, 1, n_in, W), lambda b, j: (b, j, 0, 0)),
            pl.BlockSpec((1, 1, n_mel, W), lambda b, j: (b, j, 0, 0)),
            const_spec(start_w.shape),
            const_spec(start_b.shape),
            const_spec(cond_w.shape),
            const_spec(cond_b.shape),
            const_spec(in_w.shape),
            const_spec(in_b.shape),
            const_spec(rs_w.shape),
            const_spec(rs_b.shape),
            const_spec(end_w.shape),
            const_spec(end_b.shape),
        ],
        out_specs=pl.BlockSpec((1, 2 * n_in, t_blk), lambda b, j: (b, 0, j)),
        scratch_shapes=[pltpu.VMEM((C, pad + W + pad), jnp.bfloat16)],
        compiler_params=pltpu.CompilerParams(
            dimension_semantics=("parallel", "parallel"),
            vmem_limit_bytes=32 * 1024 * 1024,
        ),
        cost_estimate=cost,
    )(audio_w, spect_w, *weights)

    return out[:, :, :T]


# --------------------------- pure-JAX reference -----------------------------
# Mirrors the kernel's numerics: bf16 matmul operands, f32 accumulation.


def conv1d_ref(x, w, b, dilation=1):
    # x: (B, Cin, T) f32, w: (Cout, Cin, K) f32, b: (Cout,)
    Kk = w.shape[2]
    T = x.shape[2]
    p = (Kk * dilation - dilation) // 2
    xp = jnp.pad(x, ((0, 0), (0, 0), (p, p))).astype(jnp.bfloat16)
    wb = w.astype(jnp.bfloat16)
    out = jnp.zeros((x.shape[0], w.shape[0], T), jnp.float32)
    for k in range(Kk):
        xs = xp[:, :, k * dilation:k * dilation + T]
        out = out + jnp.einsum("oc,bct->bot", wb[:, :, k], xs,
                               preferred_element_type=jnp.float32)
    return out + b[None, :, None]


def wn_ref(audio, spect, raw, *, n_layers, n_channels, kernel_size):
    (start_w, start_b, cond_w, cond_b,
     in_w_list, in_b_list, rs_w_list, rs_b_list, end_w, end_b) = raw
    C = n_channels
    x = conv1d_ref(audio, start_w[:, :, None], start_b)
    output = jnp.zeros_like(x)
    cond = conv1d_ref(spect, cond_w[:, :, None], cond_b)
    for i in range(n_layers):
        acts_in = conv1d_ref(x, in_w_list[i], in_b_list[i], dilation=2 ** i)
        in_act = acts_in + cond[:, i * 2 * C:(i + 1) * 2 * C, :]
        acts = jnp.tanh(in_act[:, :C, :]) * jax.nn.sigmoid(in_act[:, C:, :])
        rs = conv1d_ref(acts, rs_w_list[i][:, :, None], rs_b_list[i])
        if i < n_layers - 1:
            x = x + rs[:, :C, :]
            output = output + rs[:, C:, :]
        else:
            output = output + rs
    return conv1d_ref(output, end_w[:, :, None], end_b)


# --------------------------------- main --------------------------------------


if __name__ == "__main__":
    # Small WN config consistent with the module's asserts.
    n_in_channels = 4
    n_mel_channels = 8
    n_layers = 3
    n_channels = 16          # even
    kernel_size = 3          # odd
    B, T = 2, 200            # T not a multiple of 128: exercises tail + mask

    C, K, L = n_channels, kernel_size, n_layers

    key = jax.random.PRNGKey(0)
    keys = jax.random.split(key, 20)

    def init(k, shape, scale=0.1):
        return (scale * jax.random.normal(k, shape)).astype(jnp.float32)

    # Effective weights (weight_norm(w) == w at PyTorch init).
    start_w = init(keys[0], (C, n_in_channels))
    start_b = init(keys[1], (C,))
    cond_w = init(keys[2], (2 * C * L, n_mel_channels))
    cond_b = init(keys[3], (2 * C * L,))
    in_w_list, in_b_list, rs_w_list, rs_b_list = [], [], [], []
    for i in range(L):
        in_w_list.append(init(keys[4 + i], (2 * C, C, K)))
        in_b_list.append(init(keys[7 + i], (2 * C,)))
        rs_out = 2 * C if i < L - 1 else C
        rs_w_list.append(init(keys[10 + i], (rs_out, C)))
        rs_b_list.append(init(keys[13 + i], (rs_out,)))
    # NOTE: the PyTorch module zero-initializes the end conv. We use a NONZERO
    # end conv here so the correctness check is not vacuous.
    end_w = init(keys[16], (2 * n_in_channels, C))
    end_b = init(keys[17], (2 * n_in_channels,))

    # Pack weights for the kernel.
    p_start_w = start_w.astype(jnp.bfloat16)
    p_start_b = start_b[:, None]
    p_cond_w = cond_w.reshape(L, 2 * C, n_mel_channels).astype(jnp.bfloat16)
    p_cond_b = cond_b.reshape(L, 2 * C, 1)
    p_in_w = jnp.stack(
        [jnp.transpose(w, (0, 2, 1)).reshape(2 * C, K * C) for w in in_w_list]
    ).astype(jnp.bfloat16)                                    # (L, 2C, K*C)
    p_in_b = jnp.stack([b[:, None] for b in in_b_list])       # (L, 2C, 1)
    rs_w_p, rs_b_p = [], []
    for i in range(L):
        w, b = rs_w_list[i], rs_b_list[i]
        if w.shape[0] < 2 * C:
            w = jnp.concatenate(
                [w, jnp.zeros((2 * C - w.shape[0], C), jnp.float32)], 0)
            b = jnp.concatenate(
                [b, jnp.zeros((2 * C - b.shape[0],), jnp.float32)], 0)
        rs_w_p.append(w)
        rs_b_p.append(b[:, None])
    p_rs_w = jnp.stack(rs_w_p).astype(jnp.bfloat16)            # (L, 2C, C)
    p_rs_b = jnp.stack(rs_b_p)                                 # (L, 2C, 1)
    p_end_w = end_w.astype(jnp.bfloat16)
    p_end_b = end_b[:, None]

    params = (p_start_w, p_start_b, p_cond_w, p_cond_b,
              p_in_w, p_in_b, p_rs_w, p_rs_b, p_end_w, p_end_b)
    raw = (start_w, start_b, cond_w, cond_b,
           in_w_list, in_b_list, rs_w_list, rs_b_list, end_w, end_b)

    # Example inputs.
    ka, ks = jax.random.split(keys[18])
    audio = jax.random.normal(ka, (B, n_in_channels, T), jnp.float32)
    spect = jax.random.normal(ks, (B, n_mel_channels, T), jnp.float32)

    out = wn_forward(audio, spect, params,
                     n_layers=L, n_channels=C, kernel_size=K, t_blk=128)
    out = jax.block_until_ready(out)

    ref = wn_ref(audio, spect, raw,
                 n_layers=L, n_channels=C, kernel_size=K)

    assert out.shape == (B, 2 * n_in_channels, T)
    assert bool(jnp.all(jnp.isfinite(out)))
    max_err = float(jnp.max(jnp.abs(out - ref)))
    assert jnp.allclose(out, ref, atol=5e-3, rtol=5e-3), f"max_err={max_err}"
    print("KERNEL_OK")
</pallas_src>

<mosaic_0001>
module attributes {stable_mosaic.version = 11 : i64} {
  func.func @wn_kernel(%arg0: i32, %arg1: i32, %arg2: memref<1x1x4x384xbf16, #tpu.memory_space<vmem>>, %arg3: memref<1x1x8x384xbf16, #tpu.memory_space<vmem>>, %arg4: memref<16x4xbf16, #tpu.memory_space<vmem>>, %arg5: memref<16x1xf32, #tpu.memory_space<vmem>>, %arg6: memref<3x32x8xbf16, #tpu.memory_space<vmem>>, %arg7: memref<3x32x1xf32, #tpu.memory_space<vmem>>, %arg8: memref<3x32x48xbf16, #tpu.memory_space<vmem>>, %arg9: memref<3x32x1xf32, #tpu.memory_space<vmem>>, %arg10: memref<3x32x16xbf16, #tpu.memory_space<vmem>>, %arg11: memref<3x32x1xf32, #tpu.memory_space<vmem>>, %arg12: memref<8x16xbf16, #tpu.memory_space<vmem>>, %arg13: memref<8x1xf32, #tpu.memory_space<vmem>>, %arg14: memref<1x8x128xf32, #tpu.memory_space<vmem>>, %arg15: memref<16x640xbf16, #tpu.memory_space<vmem>>) attributes {dimension_semantics = [#tpu.dimension_semantics<parallel>, #tpu.dimension_semantics<parallel>], iteration_bounds = array<i64: 2, 2>, scalar_prefetch = 0 : i64, scratch_operands = 1 : i64, tpu.core_type = #tpu.core_type<tc>, window_params = [{transform_indices = @transform_0, window_bounds = array<i64: 1, 1, 4, 384>}, {transform_indices = @transform_1, window_bounds = array<i64: 1, 1, 8, 384>}, {pipeline_mode = #tpu.pipeline_mode<synchronous>, transform_indices = @transform_2, window_bounds = array<i64: 16, 4>}, {pipeline_mode = #tpu.pipeline_mode<synchronous>, transform_indices = @transform_3, window_bounds = array<i64: 16, 1>}, {pipeline_mode = #tpu.pipeline_mode<synchronous>, transform_indices = @transform_4, window_bounds = array<i64: 3, 32, 8>}, {pipeline_mode = #tpu.pipeline_mode<synchronous>, transform_indices = @transform_5, window_bounds = array<i64: 3, 32, 1>}, {pipeline_mode = #tpu.pipeline_mode<synchronous>, transform_indices = @transform_6, window_bounds = array<i64: 3, 32, 48>}, {pipeline_mode = #tpu.pipeline_mode<synchronous>, transform_indices = @transform_7, window_bounds = array<i64: 3, 32, 1>}, {pipeline_mode = #tpu.pipeline_mode<synchronous>, transform_indices = @transform_8, window_bounds = array<i64: 3, 32, 16>}, {pipeline_mode = #tpu.pipeline_mode<synchronous>, transform_indices = @transform_9, window_bounds = array<i64: 3, 32, 1>}, {pipeline_mode = #tpu.pipeline_mode<synchronous>, transform_indices = @transform_10, window_bounds = array<i64: 8, 16>}, {pipeline_mode = #tpu.pipeline_mode<synchronous>, transform_indices = @transform_11, window_bounds = array<i64: 8, 1>}, {transform_indices = @transform_12, window_bounds = array<i64: 1, 8, 128>}]} {
    %c0 = arith.constant 0 : index
    %c0_0 = arith.constant 0 : index
    %c0_1 = arith.constant 0 : index
    %c0_2 = arith.constant 0 : index
    %0 = vector.load %arg2[%c0, %c0_0, %c0_1, %c0_2] : memref<1x1x4x384xbf16, #tpu.memory_space<vmem>>, vector<1x1x4x384xbf16>
    %1 = vector.shape_cast %0 : vector<1x1x4x384xbf16> to vector<4x384xbf16>
    %c0_3 = arith.constant 0 : index
    %c0_4 = arith.constant 0 : index
    %c0_5 = arith.constant 0 : index
    %c0_6 = arith.constant 0 : index
    %2 = vector.load %arg3[%c0_3, %c0_4, %c0_5, %c0_6] : memref<1x1x8x384xbf16, #tpu.memory_space<vmem>>, vector<1x1x8x384xbf16>
    %3 = vector.shape_cast %2 : vector<1x1x8x384xbf16> to vector<8x384xbf16>
    %4 = tpu.iota {dimensions = array<i32: 1>} : vector<1x384xi32>
    %c128_i32 = arith.constant 128 : i32
    %5 = arith.muli %arg1, %c128_i32 : i32
    %6 = vector.broadcast %5 : i32 to vector<1x384xi32>
    %7 = arith.addi %4, %6 : vector<1x384xi32>
    %c128_i32_7 = arith.constant 128 : i32
    %8 = vector.broadcast %c128_i32_7 : i32 to vector<1x384xi32>
    %9 = arith.subi %7, %8 : vector<1x384xi32>
    %c0_i32 = arith.constant 0 : i32
    %10 = vector.broadcast %c0_i32 : i32 to vector<1x384xi32>
    %11 = arith.cmpi sge, %9, %10 : vector<1x384xi32>
    %c200_i32 = arith.constant 200 : i32
    %12 = vector.broadcast %c200_i32 : i32 to vector<1x384xi32>
    %13 = arith.cmpi slt, %9, %12 : vector<1x384xi32>
    %14 = arith.andi %11, %13 : vector<1x384xi1>
    %cst = arith.constant 0.000000e+00 : bf16
    %15 = vector.broadcast %cst : bf16 to vector<16x640xbf16>
    %c0_8 = arith.constant 0 : index
    %c0_9 = arith.constant 0 : index
    %16 = vector.load %arg15[%c0_8, %c0_9] : memref<16x640xbf16, #tpu.memory_space<vmem>>, vector<16x640xbf16>
    tpu.vector_store %arg15[%c0_8, %c0_9], %15 {strides = array<i32>} : memref<16x640xbf16, #tpu.memory_space<vmem>>, vector<16x640xbf16>,
    %c0_10 = arith.constant 0 : index
    %c0_11 = arith.constant 0 : index
    %17 = vector.load %arg4[%c0_10, %c0_11] : memref<16x4xbf16, #tpu.memory_space<vmem>>, vector<16x4xbf16>
    %cst_12 = arith.constant dense<0.000000e+00> : vector<16x384xf32>
    %18 = tpu.matmul %17, %1, %cst_12 {dimension_numbers = #tpu.dot_dimension_numbers<[1], [0], [0], [1], [0, 0, 1, 1], [], []>} : vector<16x4xbf16>, vector<4x384xbf16>, vector<16x384xf32> -> vector<16x384xf32>
    %c0_13 = arith.constant 0 : index
    %c0_14 = arith.constant 0 : index
    %19 = vector.load %arg5[%c0_13, %c0_14] : memref<16x1xf32, #tpu.memory_space<vmem>>, vector<16x1xf32>
    %20 = vector.broadcast %19 : vector<16x1xf32> to vector<16x384xf32>
    %21 = arith.addf %18, %20 : vector<16x384xf32>
    %cst_15 = arith.constant 0.000000e+00 : f32
    %22 = vector.broadcast %cst_15 : f32 to vector<16x128xf32>
    %cst_16 = arith.constant 0.000000e+00 : f32
    %23 = vector.shape_cast %14 : vector<1x384xi1> to vector<1x384xi1>
    %24 = vector.broadcast %23 : vector<1x384xi1> to vector<16x384xi1>
    %25 = vector.broadcast %cst_16 : f32 to vector<16x384xf32>
    %26 = arith.select %24, %21, %25 : vector<16x384xi1>, vector<16x384xf32>
    %27 = arith.truncf %26 : vector<16x384xf32> to vector<16x384xbf16>
    %c0_17 = arith.constant 0 : index
    %c128 = arith.constant 128 : index
    %28 = vector.load %arg15[%c0_17, %c128] : memref<16x640xbf16, #tpu.memory_space<vmem>>, vector<16x384xbf16>
    tpu.vector_store %arg15[%c0_17, %c128], %27 {strides = array<i32>} : memref<16x640xbf16, #tpu.memory_space<vmem>>, vector<16x384xbf16>,
    %c0_18 = arith.constant 0 : index
    %c127 = arith.constant 127 : index
    %29 = vector.load %arg15[%c0_18, %c127] : memref<16x640xbf16, #tpu.memory_space<vmem>>, vector<16x384xbf16>
    %c0_19 = arith.constant 0 : index
    %c128_20 = arith.constant 128 : index
    %30 = vector.load %arg15[%c0_19, %c128_20] : memref<16x640xbf16, #tpu.memory_space<vmem>>, vector<16x384xbf16>
    %c0_21 = arith.constant 0 : index
    %c129 = arith.constant 129 : index
    %31 = vector.load %arg15[%c0_21, %c129] : memref<16x640xbf16, #tpu.memory_space<vmem>>, vector<16x384xbf16>
    %32 = tpu.concatenate %29, %30, %31 in 0 : vector<16x384xbf16>, vector<16x384xbf16>, vector<16x384xbf16> -> vector<48x384xbf16>
    %c0_22 = arith.constant 0 : index
    %c0_23 = arith.constant 0 : index
    %c0_24 = arith.constant 0 : index
    %33 = vector.load %arg8[%c0_22, %c0_23, %c0_24] : memref<3x32x48xbf16, #tpu.memory_space<vmem>>, vector<1x32x48xbf16>
    %34 = vector.shape_cast %33 : vector<1x32x48xbf16> to vector<32x48xbf16>
    %cst_25 = arith.constant dense<0.000000e+00> : vector<32x384xf32>
    %35 = tpu.matmul %34, %32, %cst_25 {dimension_numbers = #tpu.dot_dimension_numbers<[1], [0], [0], [1], [0, 0, 1, 1], [], []>} : vector<32x48xbf16>, vector<48x384xbf16>, vector<32x384xf32> -> vector<32x384xf32>
    %c0_26 = arith.constant 0 : index
    %c0_27 = arith.constant 0 : index
    %c0_28 = arith.constant 0 : index
    %36 = vector.load %arg9[%c0_26, %c0_27, %c0_28] : memref<3x32x1xf32, #tpu.memory_space<vmem>>, vector<1x32x1xf32>
    %37 = vector.shape_cast %36 : vector<1x32x1xf32> to vector<32x1xf32>
    %38 = vector.broadcast %37 : vector<32x1xf32> to vector<32x384xf32>
    %39 = arith.addf %35, %38 : vector<32x384xf32>
    %c0_29 = arith.constant 0 : index
    %c0_30 = arith.constant 0 : index
    %c0_31 = arith.constant 0 : index
    %40 = vector.load %arg6[%c0_29, %c0_30, %c0_31] : memref<3x32x8xbf16, #tpu.memory_space<vmem>>, vector<1x32x8xbf16>
    %41 = vector.shape_cast %40 : vector<1x32x8xbf16> to vector<32x8xbf16>
    %cst_32 = arith.constant dense<0.000000e+00> : vector<32x384xf32>
    %42 = tpu.matmul %41, %3, %cst_32 {dimension_numbers = #tpu.dot_dimension_numbers<[1], [0], [0], [1], [0, 0, 1, 1], [], []>} : vector<32x8xbf16>, vector<8x384xbf16>, vector<32x384xf32> -> vector<32x384xf32>
    %43 = arith.addf %39, %42 : vector<32x384xf32>
    %c0_33 = arith.constant 0 : index
    %c0_34 = arith.constant 0 : index
    %c0_35 = arith.constant 0 : index
    %44 = vector.load %arg7[%c0_33, %c0_34, %c0_35] : memref<3x32x1xf32, #tpu.memory_space<vmem>>, vector<1x32x1xf32>
    %45 = vector.shape_cast %44 : vector<1x32x1xf32> to vector<32x1xf32>
    %46 = vector.broadcast %45 : vector<32x1xf32> to vector<32x384xf32>
    %47 = arith.addf %43, %46 : vector<32x384xf32>
    %48 = vector.extract_strided_slice %47 {offsets = [0, 0], sizes = [16, 384], strides = [1, 1]} : vector<32x384xf32> to vector<16x384xf32>
    %49 = math.tanh %48 : vector<16x384xf32>
    %50 = vector.extract_strided_slice %47 {offsets = [16, 0], sizes = [16, 384], strides = [1, 1]} : vector<32x384xf32> to vector<16x384xf32>
    %51 = arith.negf %50 : vector<16x384xf32>
    %52 = math.exp %51 : vector<16x384xf32>
    %cst_36 = arith.constant 1.000000e+00 : f32
    %53 = vector.broadcast %cst_36 : f32 to vector<16x384xf32>
    %54 = arith.addf %53, %52 : vector<16x384xf32>
    %55 = arith.divf %53, %54 : vector<16x384xf32>
    %56 = arith.mulf %49, %55 : vector<16x384xf32>
    %57 = arith.truncf %56 : vector<16x384xf32> to vector<16x384xbf16>
    %c0_37 = arith.constant 0 : index
    %c0_38 = arith.constant 0 : index
    %c0_39 = arith.constant 0 : index
    %58 = vector.load %arg10[%c0_37, %c0_38, %c0_39] : memref<3x32x16xbf16, #tpu.memory_space<vmem>>, vector<1x32x16xbf16>
    %59 = vector.shape_cast %58 : vector<1x32x16xbf16> to vector<32x16xbf16>
    %cst_40 = arith.constant dense<0.000000e+00> : vector<32x384xf32>
    %60 = tpu.matmul %59, %57, %cst_40 {dimension_numbers = #tpu.dot_dimension_numbers<[1], [0], [0], [1], [0, 0, 1, 1], [], []>} : vector<32x16xbf16>, vector<16x384xbf16>, vector<32x384xf32> -> vector<32x384xf32>
    %c0_41 = arith.constant 0 : index
    %c0_42 = arith.constant 0 : index
    %c0_43 = arith.constant 0 : index
    %61 = vector.load %arg11[%c0_41, %c0_42, %c0_43] : memref<3x32x1xf32, #tpu.memory_space<vmem>>, vector<1x32x1xf32>
    %62 = vector.shape_cast %61 : vector<1x32x1xf32> to vector<32x1xf32>
    %63 = vector.broadcast %62 : vector<32x1xf32> to vector<32x384xf32>
    %64 = arith.addf %60, %63 : vector<32x384xf32>
    %65 = vector.extract_strided_slice %64 {offsets = [0, 0], sizes = [16, 384], strides = [1, 1]} : vector<32x384xf32> to vector<16x384xf32>
    %66 = arith.addf %21, %65 : vector<16x384xf32>
    %67 = vector.extract_strided_slice %64 {offsets = [16, 128], sizes = [16, 128], strides = [1, 1]} : vector<32x384xf32> to vector<16x128xf32>
    %68 = arith.addf %22, %67 : vector<16x128xf32>
    %cst_44 = arith.constant 0.000000e+00 : f32
    %69 = vector.shape_cast %14 : vector<1x384xi1> to vector<1x384xi1>
    %70 = vector.broadcast %69 : vector<1x384xi1> to vector<16x384xi1>
    %71 = vector.broadcast %cst_44 : f32 to vector<16x384xf32>
    %72 = arith.select %70, %66, %71 : vector<16x384xi1>, vector<16x384xf32>
    %73 = arith.truncf %72 : vector<16x384xf32> to vector<16x384xbf16>
    %c0_45 = arith.constant 0 : index
    %c128_46 = arith.constant 128 : index
    %74 = vector.load %arg15[%c0_45, %c128_46] : memref<16x640xbf16, #tpu.memory_space<vmem>>, vector<16x384xbf16>
    tpu.vector_store %arg15[%c0_45, %c128_46], %73 {strides = array<i32>} : memref<16x640xbf16, #tpu.memory_space<vmem>>, vector<16x384xbf16>,
    %c0_47 = arith.constant 0 : index
    %c126 = arith.constant 126 : index
    %75 = vector.load %arg15[%c0_47, %c126] : memref<16x640xbf16, #tpu.memory_space<vmem>>, vector<16x384xbf16>
    %c0_48 = arith.constant 0 : index
    %c128_49 = arith.constant 128 : index
    %76 = vector.load %arg15[%c0_48, %c128_49] : memref<16x640xbf16, #tpu.memory_space<vmem>>, vector<16x384xbf16>
    %c0_50 = arith.constant 0 : index
    %c130 = arith.constant 130 : index
    %77 = vector.load %arg15[%c0_50, %c130] : memref<16x640xbf16, #tpu.memory_space<vmem>>, vector<16x384xbf16>
    %78 = tpu.concatenate %75, %76, %77 in 0 : vector<16x384xbf16>, vector<16x384xbf16>, vector<16x384xbf16> -> vector<48x384xbf16>
    %c1 = arith.constant 1 : index
    %c0_51 = arith.constant 0 : index
    %c0_52 = arith.constant 0 : index
    %79 = vector.load %arg8[%c1, %c0_51, %c0_52] : memref<3x32x48xbf16, #tpu.memory_space<vmem>>, vector<1x32x48xbf16>
    %80 = vector.shape_cast %79 : vector<1x32x48xbf16> to vector<32x48xbf16>
    %cst_53 = arith.constant dense<0.000000e+00> : vector<32x384xf32>
    %81 = tpu.matmul %80, %78, %cst_53 {dimension_numbers = #tpu.dot_dimension_numbers<[1], [0], [0], [1], [0, 0, 1, 1], [], []>} : vector<32x48xbf16>, vector<48x384xbf16>, vector<32x384xf32> -> vector<32x384xf32>
    %c1_54 = arith.constant 1 : index
    %c0_55 = arith.constant 0 : index
    %c0_56 = arith.constant 0 : index
    %82 = vector.load %arg9[%c1_54, %c0_55, %c0_56] : memref<3x32x1xf32, #tpu.memory_space<vmem>>, vector<1x32x1xf32>
    %83 = vector.shape_cast %82 : vector<1x32x1xf32> to vector<32x1xf32>
    %84 = vector.broadcast %83 : vector<32x1xf32> to vector<32x384xf32>
    %85 = arith.addf %81, %84 : vector<32x384xf32>
    %c1_57 = arith.constant 1 : index
    %c0_58 = arith.constant 0 : index
    %c0_59 = arith.constant 0 : index
    %86 = vector.load %arg6[%c1_57, %c0_58, %c0_59] : memref<3x32x8xbf16, #tpu.memory_space<vmem>>, vector<1x32x8xbf16>
    %87 = vector.shape_cast %86 : vector<1x32x8xbf16> to vector<32x8xbf16>
    %cst_60 = arith.constant dense<0.000000e+00> : vector<32x384xf32>
    %88 = tpu.matmul %87, %3, %cst_60 {dimension_numbers = #tpu.dot_dimension_numbers<[1], [0], [0], [1], [0, 0, 1, 1], [], []>} : vector<32x8xbf16>, vector<8x384xbf16>, vector<32x384xf32> -> vector<32x384xf32>
    %89 = arith.addf %85, %88 : vector<32x384xf32>
    %c1_61 = arith.constant 1 : index
    %c0_62 = arith.constant 0 : index
    %c0_63 = arith.constant 0 : index
    %90 = vector.load %arg7[%c1_61, %c0_62, %c0_63] : memref<3x32x1xf32, #tpu.memory_space<vmem>>, vector<1x32x1xf32>
    %91 = vector.shape_cast %90 : vector<1x32x1xf32> to vector<32x1xf32>
    %92 = vector.broadcast %91 : vector<32x1xf32> to vector<32x384xf32>
    %93 = arith.addf %89, %92 : vector<32x384xf32>
    %94 = vector.extract_strided_slice %93 {offsets = [0, 0], sizes = [16, 384], strides = [1, 1]} : vector<32x384xf32> to vector<16x384xf32>
    %95 = math.tanh %94 : vector<16x384xf32>
    %96 = vector.extract_strided_slice %93 {offsets = [16, 0], sizes = [16, 384], strides = [1, 1]} : vector<32x384xf32> to vector<16x384xf32>
    %97 = arith.negf %96 : vector<16x384xf32>
    %98 = math.exp %97 : vector<16x384xf32>
    %cst_64 = arith.constant 1.000000e+00 : f32
    %99 = vector.broadcast %cst_64 : f32 to vector<16x384xf32>
    %100 = arith.addf %99, %98 : vector<16x384xf32>
    %101 = arith.divf %99, %100 : vector<16x384xf32>
    %102 = arith.mulf %95, %101 : vector<16x384xf32>
    %103 = arith.truncf %102 : vector<16x384xf32> to vector<16x384xbf16>
    %c1_65 = arith.constant 1 : index
    %c0_66 = arith.constant 0 : index
    %c0_67 = arith.constant 0 : index
    %104 = vector.load %arg10[%c1_65, %c0_66, %c0_67] : memref<3x32x16xbf16, #tpu.memory_space<vmem>>, vector<1x32x16xbf16>
    %105 = vector.shape_cast %104 : vector<1x32x16xbf16> to vector<32x16xbf16>
    %cst_68 = arith.constant dense<0.000000e+00> : vector<32x384xf32>
    %106 = tpu.matmul %105, %103, %cst_68 {dimension_numbers = #tpu.dot_dimension_numbers<[1], [0], [0], [1], [0, 0, 1, 1], [], []>} : vector<32x16xbf16>, vector<16x384xbf16>, vector<32x384xf32> -> vector<32x384xf32>
    %c1_69 = arith.constant 1 : index
    %c0_70 = arith.constant 0 : index
    %c0_71 = arith.constant 0 : index
    %107 = vector.load %arg11[%c1_69, %c0_70, %c0_71] : memref<3x32x1xf32, #tpu.memory_space<vmem>>, vector<1x32x1xf32>
    %108 = vector.shape_cast %107 : vector<1x32x1xf32> to vector<32x1xf32>
    %109 = vector.broadcast %108 : vector<32x1xf32> to vector<32x384xf32>
    %110 = arith.addf %106, %109 : vector<32x384xf32>
    %111 = vector.extract_strided_slice %110 {offsets = [0, 0], sizes = [16, 384], strides = [1, 1]} : vector<32x384xf32> to vector<16x384xf32>
    %112 = arith.addf %66, %111 : vector<16x384xf32>
    %113 = vector.extract_strided_slice %110 {offsets = [16, 128], sizes = [16, 128], strides = [1, 1]} : vector<32x384xf32> to vector<16x128xf32>
    %114 = arith.addf %68, %113 : vector<16x128xf32>
    %cst_72 = arith.constant 0.000000e+00 : f32
    %115 = vector.shape_cast %14 : vector<1x384xi1> to vector<1x384xi1>
    %116 = vector.broadcast %115 : vector<1x384xi1> to vector<16x384xi1>
    %117 = vector.broadcast %cst_72 : f32 to vector<16x384xf32>
    %118 = arith.select %116, %112, %117 : vector<16x384xi1>, vector<16x384xf32>
    %119 = arith.truncf %118 : vector<16x384xf32> to vector<16x384xbf16>
    %c0_73 = arith.constant 0 : index
    %c128_74 = arith.constant 128 : index
    %120 = vector.load %arg15[%c0_73, %c128_74] : memref<16x640xbf16, #tpu.memory_space<vmem>>, vector<16x384xbf16>
    tpu.vector_store %arg15[%c0_73, %c128_74], %119 {strides = array<i32>} : memref<16x640xbf16, #tpu.memory_space<vmem>>, vector<16x384xbf16>,
    %c0_75 = arith.constant 0 : index
    %c252 = arith.constant 252 : index
    %121 = vector.load %arg15[%c0_75, %c252] : memref<16x640xbf16, #tpu.memory_space<vmem>>, vector<16x128xbf16>
    %c0_76 = arith.constant 0 : index
    %c256 = arith.constant 256 : index
    %122 = vector.load %arg15[%c0_76, %c256] : memref<16x640xbf16, #tpu.memory_space<vmem>>, vector<16x128xbf16>
    %c0_77 = arith.constant 0 : index
    %c260 = arith.constant 260 : index
    %123 = vector.load %arg15[%c0_77, %c260] : memref<16x640xbf16, #tpu.memory_space<vmem>>, vector<16x128xbf16>
    %124 = tpu.concatenate %121, %122, %123 in 0 : vector<16x128xbf16>, vector<16x128xbf16>, vector<16x128xbf16> -> vector<48x128xbf16>
    %c2 = arith.constant 2 : index
    %c0_78 = arith.constant 0 : index
    %c0_79 = arith.constant 0 : index
    %125 = vector.load %arg8[%c2, %c0_78, %c0_79] : memref<3x32x48xbf16, #tpu.memory_space<vmem>>, vector<1x32x48xbf16>
    %126 = vector.shape_cast %125 : vector<1x32x48xbf16> to vector<32x48xbf16>
    %cst_80 = arith.constant dense<0.000000e+00> : vector<32x128xf32>
    %127 = tpu.matmul %126, %124, %cst_80 {dimension_numbers = #tpu.dot_dimension_numbers<[1], [0], [0], [1], [0, 0, 1, 1], [], []>} : vector<32x48xbf16>, vector<48x128xbf16>, vector<32x128xf32> -> vector<32x128xf32>
    %c2_81 = arith.constant 2 : index
    %c0_82 = arith.constant 0 : index
    %c0_83 = arith.constant 0 : index
    %128 = vector.load %arg9[%c2_81, %c0_82, %c0_83] : memref<3x32x1xf32, #tpu.memory_space<vmem>>, vector<1x32x1xf32>
    %129 = vector.shape_cast %128 : vector<1x32x1xf32> to vector<32x1xf32>
    %130 = vector.broadcast %129 : vector<32x1xf32> to vector<32x128xf32>
    %131 = arith.addf %127, %130 : vector<32x128xf32>
    %132 = vector.extract_strided_slice %3 {offsets = [0, 128], sizes = [8, 128], strides = [1, 1]} : vector<8x384xbf16> to vector<8x128xbf16>
    %c2_84 = arith.constant 2 : index
    %c0_85 = arith.constant 0 : index
    %c0_86 = arith.constant 0 : index
    %133 = vector.load %arg6[%c2_84, %c0_85, %c0_86] : memref<3x32x8xbf16, #tpu.memory_space<vmem>>, vector<1x32x8xbf16>
    %134 = vector.shape_cast %133 : vector<1x32x8xbf16> to vector<32x8xbf16>
    %cst_87 = arith.constant dense<0.000000e+00> : vector<32x128xf32>
    %135 = tpu.matmul %134, %132, %cst_87 {dimension_numbers = #tpu.dot_dimension_numbers<[1], [0], [0], [1], [0, 0, 1, 1], [], []>} : vector<32x8xbf16>, vector<8x128xbf16>, vector<32x128xf32> -> vector<32x128xf32>
    %136 = arith.addf %131, %135 : vector<32x128xf32>
    %c2_88 = arith.constant 2 : index
    %c0_89 = arith.constant 0 : index
    %c0_90 = arith.constant 0 : index
    %137 = vector.load %arg7[%c2_88, %c0_89, %c0_90] : memref<3x32x1xf32, #tpu.memory_space<vmem>>, vector<1x32x1xf32>
    %138 = vector.shape_cast %137 : vector<1x32x1xf32> to vector<32x1xf32>
    %139 = vector.broadcast %138 : vector<32x1xf32> to vector<32x128xf32>
    %140 = arith.addf %136, %139 : vector<32x128xf32>
    %141 = vector.extract_strided_slice %140 {offsets = [0, 0], sizes = [16, 128], strides = [1, 1]} : vector<32x128xf32> to vector<16x128xf32>
    %142 = math.tanh %141 : vector<16x128xf32>
    %143 = vector.extract_strided_slice %140 {offsets = [16, 0], sizes = [16, 128], strides = [1, 1]} : vector<32x128xf32> to vector<16x128xf32>
    %144 = arith.negf %143 : vector<16x128xf32>
    %145 = math.exp %144 : vector<16x128xf32>
    %cst_91 = arith.constant 1.000000e+00 : f32
    %146 = vector.broadcast %cst_91 : f32 to vector<16x128xf32>
    %147 = arith.addf %146, %145 : vector<16x128xf32>
    %148 = arith.divf %146, %147 : vector<16x128xf32>
    %149 = arith.mulf %142, %148 : vector<16x128xf32>
    %150 = arith.truncf %149 : vector<16x128xf32> to vector<16x128xbf16>
    %c2_92 = arith.constant 2 : index
    %c0_93 = arith.constant 0 : index
    %c0_94 = arith.constant 0 : index
    %151 = vector.load %arg10[%c2_92, %c0_93, %c0_94] : memref<3x32x16xbf16, #tpu.memory_space<vmem>>, vector<1x16x16xbf16>
    %152 = vector.shape_cast %151 : vector<1x16x16xbf16> to vector<16x16xbf16>
    %cst_95 = arith.constant dense<0.000000e+00> : vector<16x128xf32>
    %153 = tpu.matmul %152, %150, %cst_95 {dimension_numbers = #tpu.dot_dimension_numbers<[1], [0], [0], [1], [0, 0, 1, 1], [], []>} : vector<16x16xbf16>, vector<16x128xbf16>, vector<16x128xf32> -> vector<16x128xf32>
    %154 = arith.addf %114, %153 : vector<16x128xf32>
    %c2_96 = arith.constant 2 : index
    %c0_97 = arith.constant 0 : index
    %c0_98 = arith.constant 0 : index
    %155 = vector.load %arg11[%c2_96, %c0_97, %c0_98] : memref<3x32x1xf32, #tpu.memory_space<vmem>>, vector<1x16x1xf32>
    %156 = vector.shape_cast %155 : vector<1x16x1xf32> to vector<16x1xf32>
    %157 = vector.broadcast %156 : vector<16x1xf32> to vector<16x128xf32>
    %158 = arith.addf %154, %157 : vector<16x128xf32>
    %c0_99 = arith.constant 0 : index
    %c0_100 = arith.constant 0 : index
    %159 = vector.load %arg12[%c0_99, %c0_100] : memref<8x16xbf16, #tpu.memory_space<vmem>>, vector<8x16xbf16>
    %160 = arith.truncf %158 : vector<16x128xf32> to vector<16x128xbf16>
    %cst_101 = arith.constant dense<0.000000e+00> : vector<8x128xf32>
    %161 = tpu.matmul %159, %160, %cst_101 {dimension_numbers = #tpu.dot_dimension_numbers<[1], [0], [0], [1], [0, 0, 1, 1], [], []>} : vector<8x16xbf16>, vector<16x128xbf16>, vector<8x128xf32> -> vector<8x128xf32>
    %c0_102 = arith.constant 0 : index
    %c0_103 = arith.constant 0 : index
    %162 = vector.load %arg13[%c0_102, %c0_103] : memref<8x1xf32, #tpu.memory_space<vmem>>, vector<8x1xf32>
    %163 = vector.broadcast %162 : vector<8x1xf32> to vector<8x128xf32>
    %164 = arith.addf %161, %163 : vector<8x128xf32>
    %c0_104 = arith.constant 0 : index
    %c0_105 = arith.constant 0 : index
    %c0_106 = arith.constant 0 : index
    %165 = vector.load %arg14[%c0_104, %c0_105, %c0_106] : memref<1x8x128xf32, #tpu.memory_space<vmem>>, vector<1x8x128xf32>
    %166 = vector.shape_cast %165 : vector<1x8x128xf32> to vector<8x128xf32>
    %167 = vector.shape_cast %164 : vector<8x128xf32> to vector<1x8x128xf32>
    tpu.vector_store %arg14[%c0_104, %c0_105, %c0_106], %167 {strides = array<i32>} : memref<1x8x128xf32, #tpu.memory_space<vmem>>, vector<1x8x128xf32>,
    return
  }
  func.func @transform_0(%arg0: i32, %arg1: i32) -> (i32, i32, i32, i32) {
    %c0_i32 = arith.constant 0 : i32
    %c0_i32_0 = arith.constant 0 : i32
    %c0_i32_1 = arith.constant 0 : i32
    return %arg0, %arg1, %c0_i32, %c0_i32_0 : i32, i32, i32, i32
  }
  func.func @transform_1(%arg0: i32, %arg1: i32) -> (i32, i32, i32, i32) {
    %c0_i32 = arith.constant 0 : i32
    %c0_i32_0 = arith.constant 0 : i32
    %c0_i32_1 = arith.constant 0 : i32
    return %arg0, %arg1, %c0_i32, %c0_i32_0 : i32, i32, i32, i32
  }
  func.func @transform_2(%arg0: i32, %arg1: i32) -> (i32, i32) {
    %c0_i32 = arith.constant 0 : i32
    %c0_i32_0 = arith.constant 0 : i32
    %c0_i32_1 = arith.constant 0 : i32
    return %c0_i32, %c0_i32_0 : i32, i32
  }
  func.func @transform_3(%arg0: i32, %arg1: i32) -> (i32, i32) {
    %c0_i32 = arith.constant 0 : i32
    %c0_i32_0 = arith.constant 0 : i32
    %c0_i32_1 = arith.constant 0 : i32
    return %c0_i32, %c0_i32_0 : i32, i32
  }
  func.func @transform_4(%arg0: i32, %arg1: i32) -> (i32, i32, i32) {
    %c0_i32 = arith.constant 0 : i32
    %c0_i32_0 = arith.constant 0 : i32
    %c0_i32_1 = arith.constant 0 : i32
    %c0_i32_2 = arith.constant 0 : i32
    return %c0_i32, %c0_i32_0, %c0_i32_1 : i32, i32, i32
  }
  func.func @transform_5(%arg0: i32, %arg1: i32) -> (i32, i32, i32) {
    %c0_i32 = arith.constant 0 : i32
    %c0_i32_0 = arith.constant 0 : i32
    %c0_i32_1 = arith.constant 0 : i32
    %c0_i32_2 = arith.constant 0 : i32
    return %c0_i32, %c0_i32_0, %c0_i32_1 : i32, i32, i32
  }
  func.func @transform_6(%arg0: i32, %arg1: i32) -> (i32, i32, i32) {
    %c0_i32 = arith.constant 0 : i32
    %c0_i32_0 = arith.constant 0 : i32
    %c0_i32_1 = arith.constant 0 : i32
    %c0_i32_2 = arith.constant 0 : i32
    return %c0_i32, %c0_i32_0, %c0_i32_1 : i32, i32, i32
  }
  func.func @transform_7(%arg0: i32, %arg1: i32) -> (i32, i32, i32) {
    %c0_i32 = arith.constant 0 : i32
    %c0_i32_0 = arith.constant 0 : i32
    %c0_i32_1 = arith.constant 0 : i32
    %c0_i32_2 = arith.constant 0 : i32
    return %c0_i32, %c0_i32_0, %c0_i32_1 : i32, i32, i32
  }
  func.func @transform_8(%arg0: i32, %arg1: i32) -> (i32, i32, i32) {
    %c0_i32 = arith.constant 0 : i32
    %c0_i32_0 = arith.constant 0 : i32
    %c0_i32_1 = arith.constant 0 : i32
    %c0_i32_2 = arith.constant 0 : i32
    return %c0_i32, %c0_i32_0, %c0_i32_1 : i32, i32, i32
  }
  func.func @transform_9(%arg0: i32, %arg1: i32) -> (i32, i32, i32) {
    %c0_i32 = arith.constant 0 : i32
    %c0_i32_0 = arith.constant 0 : i32
    %c0_i32_1 = arith.constant 0 : i32
    %c0_i32_2 = arith.constant 0 : i32
    return %c0_i32, %c0_i32_0, %c0_i32_1 : i32, i32, i32
  }
  func.func @transform_10(%arg0: i32, %arg1: i32) -> (i32, i32) {
    %c0_i32 = arith.constant 0 : i32
    %c0_i32_0 = arith.constant 0 : i32
    %c0_i32_1 = arith.constant 0 : i32
    return %c0_i32, %c0_i32_0 : i32, i32
  }
  func.func @transform_11(%arg0: i32, %arg1: i32) -> (i32, i32) {
    %c0_i32 = arith.constant 0 : i32
    %c0_i32_0 = arith.constant 0 : i32
    %c0_i32_1 = arith.constant 0 : i32
    return %c0_i32, %c0_i32_0 : i32, i32
  }
  func.func @transform_12(%arg0: i32, %arg1: i32) -> (i32, i32, i32) {
    %c0_i32 = arith.constant 0 : i32
    %c0_i32_0 = arith.constant 0 : i32
    return %arg0, %c0_i32, %arg1 : i32, i32, i32
  }
}

</mosaic_0001>

<bundles_post_ra>
// kernel: tpu_custom_call.1
= control target key start
LH: loop header
LB: loop body
LE: loop exit
PB: predicated region body
PF: predicated region fallthrough
CT: control target
= control target key end

     0   :  { %s3828_s0 = inlined_call_operand.vmem [shape: bf16[2,2,4,384], index: 0, kind: input, shape index: {}]   ;;  %s3829_s1 = inlined_call_operand.vmem [shape: bf16[2,2,8,384], index: 1, kind: input, shape index: {}]   ;;  %s3830_s2 = inlined_call_operand.vmem [shape: bf16[16,4], index: 2, kind: input, shape index: {}]   ;;  %s3831_s3 = inlined_call_operand.vmem [shape: f32[16,1], index: 3, kind: input, shape index: {}]   ;;  %s3832_s4 = inlined_call_operand.vmem [shape: bf16[3,32,8], index: 4, kind: input, shape index: {}]   ;;  %s3833_s5 = inlined_call_operand.vmem [shape: f32[3,32,1], index: 5, kind: input, shape index: {}]   ;;  %s3834_s6 = inlined_call_operand.vmem [shape: bf16[3,32,48], index: 6, kind: input, shape index: {}]   ;;  %s3835_s7 = inlined_call_operand.vmem [shape: f32[3,32,1], index: 7, kind: input, shape index: {}]   ;;  %s3836_s8 = inlined_call_operand.vmem [shape: bf16[3,32,16], index: 8, kind: input, shape index: {}]   ;;  %s3837_s9 = inlined_call_operand.vmem [shape: f32[3,32,1], index: 9, kind: input, shape index: {}]   ;;  %s3838_s10 = inlined_call_operand.vmem [shape: bf16[8,16], index: 10, kind: input, shape index: {}]   ;;  %s3839_s11 = inlined_call_operand.vmem [shape: f32[8,1], index: 11, kind: input, shape index: {}]   ;;  %s3840_s12 = inlined_call_operand.hbm [shape: f32[2,8,256], index: 12, kind: output, shape index: {}]  }
   0x1   :  { %3851 = sst [smem:[#allocation15_spill]] %s3840_s12 }
   0x2   :  { %17 = vsyncpa [#allocation4], 0 }
   0x3   :  { %19 = vsyncpa [#allocation4 + $0x1], 0  ;;  %s3234_s21 = smov 0   ;;  %s3236_s22 = smov 0  }
   0x4   :  { %s3238_s23 = smov 0   ;;  %s3240_s24 = smov 0  }
   0x5   :  { %s3242_s25 = smov 0   ;;  %s3244_s26 = smov 0  }
   0x6   :  { %s3246_s27 = smov 0   ;;  %s3248_s28 = smov 0  }
   0x7 LB: > { %3852 = sst [smem:[#allocation6_spill]] %s3127_s21  ;;  %s2542_s29 = sadd.s32 4294967295, %s3155_s28   ;;  %s3155_s28 = sphi %s3248_s28, %s25_s28   ;;  %s3151_s27 = sphi %s3246_s27, %s3878_s27   ;;  %s3147_s26 = sphi %s3244_s26, %s3877_s26   ;;  %s3143_s25 = sphi %s3242_s25, %s3876_s25   ;;  %s3139_s24 = sphi %s3240_s24, %s3875_s24   ;;  %s3135_s23 = sphi %s3238_s23, %s3874_s23   ;;  %s3131_s22 = sphi %s3236_s22, %s3880_s22   ;;  %s3127_s21 = sphi %s3234_s21, %s3879_s21  }
   0x8   : > { %3853 = sst [smem:[#allocation7_spill]] %s3135_s23  ;;  %s2543_s30 = sadd.s32 4294967294, %s3155_s28  }
   0x9   : > { %3854 = sst [smem:[#allocation8_spill]] %s3147_s26  ;;  %s34_s13 = sadd.s32 1, %s3147_s26 }
   0xa   : > { %3855 = sst [smem:[#allocation9_spill]] %s3151_s27  ;;  %p35_p0 = scmp.ge.s32.totalorder %s34_s13, 2 }
   0xb   : > { %3856 = sst [smem:[#allocation10_spill]] %s3155_s28  ;;  %s37_s14 = sadd.s32 1, %s3151_s27 }
   0xc   : > { %p322_p1 = scmp.ne.s32.totalorder %s3135_s23, %s3131_s22  ;;  %p323_p2 = scmp.eq.s32.totalorder %s2542_s29, 3 }
   0xd   : > { %s3882_s13 = smov (%p35_p0, %s34_s13), 0  ;;  %s3884_s14 = smov (!%p35_p0, %s37_s14), %s3151_s27 }
   0xe   : > { %3857 = sst [smem:[#allocation11_spill]] %s3882_s13  ;;  %s308_s15 = ssub.s32 %s3147_s26, %s3882_s13 }
   0xf   : > { %p3285_p3 = por %p323_p2, %p322_p1  ;;  %p39_p4 = scmp.ge.s32.totalorder %s3884_s14, 2 }
  0x10   : > { %p328_p5 = scmp.ne.s32.totalorder %s3131_s22, %s3127_s21  ;;  %p329_p6 = scmp.eq.s32.totalorder %s2543_s30, 3 }
  0x11   : > { %p2546_p7 = scmp.ge.s32.totalorder %s3155_s28, 1  ;;  %s3886_s14 = smov (%p39_p4, %s3884_s14), 0 }
  0x12   : > { %3859 = sst [smem:[#allocation12_spill]] %s3886_s14  ;;  %p3294_p8 = por %p329_p6, %p328_p5 }
  0x13   : > { %p401_p9 = scmp.lt.s32.totalorder %s3155_s28, 5  ;;  %s307_s18 = ssub.s32 %s3151_s27, %s3886_s14 }
  0x14   : > { %s3860_s17 = scalar_select %p3294_p8, 1, 0 }
  0x15   : > { %s312_s19 = sadd.s32 1, %s3135_s23  ;;  %s309_s20 = sor.u32 %s308_s15, %s307_s18 }
  0x16   : > { %3861 = sst [smem:[#allocation13_spill]] %s3860_s17  ;;  %p402_p10 = pnand %p2546_p7, %p401_p9 }
  0x17   : > { %p310_p11 = scmp.eq.s32.totalorder %s309_s20, 0  ;;  %p456_p12 = scmp.lt.s32.totalorder (!%p402_p10), %s3143_s25, 1 }
  0x18   : > { %405 = sbr.rel (%p402_p10) target bundleno = 2619 (0xa3b), region = 68  ;;  %p458_p13 = scmp.lt.s32.totalorder (!%p402_p10), %s3139_s24, 1 }
  0x19   : > { %s3303_s29 = scalar_select %p310_p11, %s3135_s23, %s312_s19  }
  0x1a   : > { %s2550_s21 = sshll.u32 (!%p402_p10), %s3139_s24, 7  ;;  %s3161_s23 = smov (!%p402_p10), 126  }
  0x1b   : > { %3862 = sst [smem:[#allocation14_spill]] %s3303_s29  ;;  %s3162_s28 = smov (!%p402_p10), 127  }
  0x1c   : > { %s3163_s13 = smov (!%p402_p10), 1  }
  0x1d   : > { %v478_v0 = vlaneseq  ;;  %v3157_v1 = vmov 1983009808   ;;  %v3158_v3 = vmov 0.0   ;;  %s457_s30 = scalar_select %p456_p12, %s3143_s25, 1  ;;  %v3159_v4 = vmov 0   ;;  %v507_v5 = vld [vmem:[%s3831_s3] sm:$0xff] }
  0x1e   : > { %v527_v2 = vunpack.c.l.s4 %v3157_v1  ;;  %2760 = vmatprep.subr.bf16.mxu1 %v3158_v3  ;;  %587 = vmatprep.mubr.bf16.mxu0 %v3159_v4  ;;  %499 = vst [vmem:[#allocation2] sm:$0xff] %v3159_v4  ;;  %500 = vst [vmem:[#allocation2 + $0x8] sm:$0xff] %v3159_v4  ;;  %vm3160_vm0 = vmmov 0   ;;  %s459_s19 = scalar_select %p458_p13, %s3139_s24, 1  ;;  %v508_v8 = vld [vmem:[%s3831_s3 + $0x8] sm:$0xff]  ;;  %vm545_vm1 = vcmask 1041408   ;;  %v483_v20 = vstv %s2550_s21 }
  0x1f   : > { %501 = vst [vmem:[#allocation2 + $0x10] sm:$0xf] %v3159_v4  ;;  %502 = vst [vmem:[#allocation2 + $0x14] sm:$0xff] %v3159_v4  ;;  %2762 = vmatprep.mubr.msk.bf16.mxu1 %vm3160_vm0, %v3158_v3  ;;  %v530_v7 = vshrl.u32 %v478_v0, 7  ;;  %2925 = vset.pattern.permute.xlu0 %v3159_v4  ;;  %s2842_s20 = smul.u32 6, %s457_s30  ;;  %v2928_v16 = vld [vmem:[%s3830_s2] sm:$0xff]  }
  0x20   : > { %503 = vst [vmem:[#allocation2 + $0x1c] sm:$0xff] %v3159_v4  ;;  %504 = vst [vmem:[#allocation2 + $0x24] sm:$0xf] %v3159_v4  ;;  %v528_v6 = vunpack.c.0.s8 %v527_v2  ;;  %2926 = vset.pattern.permute.xlu1 %v3159_v4  ;;  %511 = vperm.xlu0 %2925, %v507_v5   ;;  %s2841_s14 = smul.u32 3, %s459_s19  ;;  %vm541_vm2 = vcmask 31744   ;;  %v479_v18 = vand.u32 127, %v478_v0 }
  0x21   : > { %vm749_vm12 = vcmask 1031168   ;;  %vm722_vm13 = vcmask 1039360   ;;  %vm834_vm14 = vcmask 392192   ;;  %vm815_vm15 = vcmask 7168   ;;  %s3166_s21 = smov 120   ;;  %v2970_v30 = vld [vmem:[%s3832_s4 + $0x20] sm:$0xff]  }
  0x22   : > { %s462_s26 = sadd.s32 %s2842_s20, %s2841_s14  ;;  %v531_v9 = vsub.s32 %v528_v6, %v530_v7  ;;  %v481_v19 = vadd.s32 256, %v479_v18  ;;  %v480_v21 = vadd.s32 128, %v479_v18  ;;  %v484_v23 = vadd.s32 %v483_v20, %v479_v18  ;;  %v1099_v18 = vld [vmem:[%s3833_s5 + $0x18] sm:$0xff]  ;;  %s3164_s20 = smov 124   ;;  %v2971_v35 = vld [vmem:[%s3832_s4 + $0x28] sm:$0xff]  }
  0x23   : > { %s2548_s29 = sshll.u32 %s462_s26, 1  ;;  %s2549_s15 = sshll.u32 %s462_s26, 2 }
  0x24   : > { %516 = vperm.xlu0 %2925, %v508_v8   ;;  %s464_s17 = scalar_lea.vmem %s3828_s0, %s2548_s29  ;;  %s3335_s12 = scalar_lea.vmem %s3829_s1, %s2549_s15  ;;  %v486_v22 = vadd.s32 %v483_v20, %v481_v19  ;;  %v485_v24 = vadd.s32 %v483_v20, %v480_v21  ;;  %v2551_v26 = vadd.s32 4294967168, %v484_v23  ;;  %v758_v19 = vld [vmem:[%s3835_s7 + $0x8] sm:$0xff]  ;;  %v759_v21 = vld [vmem:[%s3835_s7 + $0x10] sm:$0xff] }
  0x25   : > { %v475_v10 = vld [vmem:[%s464_s17] sm:$0x3f]  ;;  %v1097_v20 = vld [vmem:[%s3833_s5 + $0x8] sm:$0xff]  ;;  %v1098_v23 = vld [vmem:[%s3833_s5 + $0x10] sm:$0xff]  ;;  %s3165_s15 = smov 2   ;;  %s453_s26 = sand.u32 1, %s3131_s22  }
  0x26   : > { %v532_v11 = vrot.slane %v475_v10, %v531_v9  ;;  %v525_v12 = vcombine.high %v475_v10, %v475_v10  ;;  %v2553_v25 = vadd.s32 4294967168, %v486_v22  ;;  %v2552_v27 = vadd.s32 4294967168, %v485_v24  ;;  %v1188_v22 = vld [vmem:[%s3837_s9 + $0x8] sm:$0xff]  ;;  %v757_v24 = vld [vmem:[%s3835_s7] sm:$0xff]  ;;  %s3869_s30 = sld [smem:[#allocation15_spill]] }
  0x27   : > { %vm490_vm5 = vcmp.ge.s32.totalorder %v2551_v26, 0  ;;  %vm493_vm6 = vcmp.lt.s32.totalorder %v2551_v26, 200  ;;  %v2929_v57 = vld [vmem:[#allocation2 + $0x10] ss:$20 sps:$4 sm:$0xff]  }
  0x28   : > { %v540_v13 = vcombine.high %v532_v11, %v532_v11  ;;  %v547_v14 = vsel %vm545_vm1, %v532_v11, 0  ;;  %v539_v15 = vrot.slane %v525_v12, %v531_v9  ;;  %vm492_vm3 = vcmp.ge.s32.totalorder %v2553_v25, 0  ;;  %vm3348_vm10 = vmand %vm490_vm5, %vm493_vm6  ;;  %747 = vrot.lane.b32.xlu0 %v2929_v57, %s3161_s23  ;;  %v3401_v12 = vld [vmem:[%s3834_s6] sm:$0xff]  }
  0x29   : > { %vm495_vm4 = vcmp.lt.s32.totalorder %v2553_v25, 200  ;;  %vm491_vm7 = vcmp.ge.s32.totalorder %v2552_v27, 0  ;;  %vm494_vm8 = vcmp.lt.s32.totalorder %v2552_v27, 200  ;;  %v1096_v25 = vld [vmem:[%s3833_s5] sm:$0xff]  ;;  %vm1437_vm5 = vcmask 1014784  }
  0x2a   : > { %2555 = vmatprep.subr.msk.bf16.mxu0 %vm545_vm1, %v540_v13  ;;  %v553_v17 = vsel %vm545_vm1, %v539_v15, 0  ;;  %vm3344_vm9 = vmand %vm492_vm3, %vm495_vm4  ;;  %v1187_v26 = vld [vmem:[%s3837_s9] sm:$0xff]  ;;  %vm972_vm1 = vcmask 1043456   ;;  %vm965_vm3 = vcmask 64512   ;;  %vm1221_vm4 = vcmask 130048  }
  0x2b   : > { %570 = vmatpush1.bf16.msra.mxu0 %v547_v14  ;;  %2761 = vmatpush3.bf16.msra.mxu1 %v553_v17  ;;  %vm3356_vm11 = vmand %vm491_vm7, %vm494_vm8  ;;  %v760_v17 = vld [vmem:[%s3835_s7 + $0x18] sm:$0xff]  ;;  %vm1505_vm6 = vcmask 15360   ;;  %vm2070_vm7 = vcmask 982016  }
  0x2e   : > { %2556 = vmatmul.mubr.msk.bf16.vlgmr.msra.gmra.mxu0 %vm541_vm2, %v2928_v16  ;;  %2763 = vmatmul.mubr.msk.bf16.vlgmr.msra.gmra.mxu1 %vm541_vm2, %v2928_v16  ;;  %v2938_v16 = vld [vmem:[#allocation2] ss:$20 sps:$4 sm:$0xff]  }
  0x2f   : > { %873 = vmatprep.mubr.bf16.mxu0 %v3159_v4  ;;  %2772 = vmatprep.mubr.msk.bf16.mxu1 %vm834_vm14, %v3401_v12 }
  0x9b   : > { %v512_v28 = vpop.permute.xlu0 %511 }
  0x9f   : > { %v517_v38 = vpop.permute.xlu0 %516 }
  0xa3   : > { %v748_v1 = vpop.permute.xlu0 %747 }
  0xee   : > { %v589_v29 = vpop.f32.mrf.mxu0  ;;  %v632_v31 = vpop.f32.mrf.mxu1 }
  0xef   : > { %v3352_v33 = vadd.f32 %v589_v29, %v512_v28  ;;  %v3354_v34 = vadd.f32 %v632_v31, %v512_v28 }
  0xf0   : > { %v591_v36 = vpop.f32.mrf.mxu0  ;;  %v2764_v37 = vpop.f32.mrf.mxu1 }
  0xf1   : > { %v647_v39 = vsel %vm3344_vm9, %v3354_v34, 0.0  ;;  %v3363_v40 = vadd.f32 %v591_v36, %v512_v28  ;;  %v645_v44 = vsel %vm3348_vm10, %v3352_v33, 0.0 }
  0xf2   : > { %v2713_v41 = vpack.c.bf16 %v647_v39, %v647_v39  ;;  %v593_v42 = vpop.f32.mrf.mxu0  ;;  %v635_v43 = vpop.f32.mrf.mxu1 }
  0xf3   : > { %v646_v45 = vsel %vm3356_vm11, %v3363_v40, 0.0  ;;  %v3371_v46 = vadd.f32 %v593_v42, %v517_v38  ;;  %v3373_v47 = vadd.f32 %v635_v43, %v517_v38 }
  0xf4   : > { %672 = vst [vmem:[#allocation2 + $0xc] sm:$0xf] %v2713_v41  ;;  %v2712_v48 = vpack.c.bf16 %v646_v45, %v645_v44  ;;  %v595_v49 = vpop.f32.mrf.mxu0  ;;  %v2765_v50 = vpop.f32.mrf.mxu1 }
  0xf5   : > { %v650_v51 = vsel %vm3344_vm9, %v3373_v47, 0.0  ;;  %v3378_v52 = vadd.f32 %v595_v49, %v517_v38  ;;  %v648_v54 = vsel %vm3348_vm10, %v3371_v46, 0.0 }
  0xf6   : > { %671 = vst [vmem:[#allocation2 + $0x4] sm:$0xff] %v2712_v48  ;;  %v2715_v53 = vpack.c.bf16 %v650_v51, %v650_v51  ;;  %v3058_v60 = vpack.c.bf16 %v648_v54, %v645_v44 }
  0xf7   : > { %v649_v55 = vsel %vm3356_vm11, %v3378_v52, 0.0 }
  0xf8   : > { %674 = vst [vmem:[#allocation2 + $0x20] sm:$0xf] %v2715_v53  ;;  %v2714_v56 = vpack.c.bf16 %v649_v55, %v648_v54  ;;  %v3057_v59 = vpack.c.bf16 %v649_v55, %v646_v45  ;;  %v476_v45 = vld [vmem:[%s3335_s12] sm:$0xff] }
  0xf9   : > { %v3449_v54 = vcombine.high %v476_v45, %v476_v45  ;;  %v2581_v55 = vcombine.low %v476_v45, %v476_v45 }
  0xfa   : > { %673 = vst [vmem:[#allocation2 + $0x18] sm:$0xff] %v2714_v56  ;;  %718 = vrot.lane.b32.xlu0 %v3057_v59, %s3162_s28 }
  0xfb   : > { %v977_v32 = vsel %vm972_vm1, %v3449_v54, 0 }
  0xfe   : > { %716 = vrot.lane.b32.xlu0 %v3058_v60, %s3162_s28 }
  0xff   : > { %v2931_v58 = vld [vmem:[#allocation2 + $0xc] ss:$20 sps:$4 sm:$0xff]  }
 0x100   : > { %745 = vrot.lane.b32.xlu1 %v2931_v58, %s3161_s23  ;;  %v2932_v61 = vld [vmem:[#allocation2 + $0xc] ss:$20 sps:$4 sm:$0xff]  }
 0x101   : > { %v2933_v62 = vld [vmem:[#allocation2 + $0xc] ss:$20 sps:$4 sm:$0xff]   ;;  %v2935_v63 = vld [vmem:[#allocation2 + $0x8] ss:$20 sps:$4 sm:$0xff]   ;;  %v2936_v15 = vld [vmem:[#allocation2 + $0x4] ss:$20 sps:$4 sm:$0xff]  }
 0x102   : > { %797 = vrot.lane.b32.xlu0 %v2933_v62, %s3163_s13  ;;  %v2940_v58 = vld [vmem:[%s3834_s6 + $0x8] sm:$0xff]  }
 0x104   : > { %743 = vrot.lane.b32.xlu1 %v3057_v59, %s3161_s23  ;;  %v3457_v59 = vld [vmem:[%s3335_s12 + $0x8] ss:$0 sps:$4 sm:$0xff]   ;;  %s2708_s12 = sshll.u32 %s3143_s25, 1 }
 0x108   : > { %741 = vrot.lane.b32.xlu1 %v3058_v60, %s3161_s23 }
 0x10c   : > { %720 = vrot.lane.b32.xlu1 %v2932_v61, %s3162_s28  ;;  %v3462_v61 = vsel %vm972_vm1, %v2581_v55, 0  ;;  %s2436_s28 = sadd.s32 %s3139_s24, %s2708_s12  ;;  %s2425_s24 = scalar_lea.sflag [#allocation4], %s453_s26 }
 0x110   : > { %795 = vrot.lane.b32.xlu1 %v2935_v63, %s3163_s13  ;;  %v3470_v63 = vsel %vm972_vm1, %v3457_v59, 0 }
 0x16c   : > { %v719_v6 = vpop.permute.xlu0 %718 }
 0x170   : > { %v717_v11 = vpop.permute.xlu0 %716 }
 0x171   : > { %v723_v14 = vsel %vm722_vm13, %v717_v11, %v719_v6 }
 0x172   : > { %v746_v0 = vpop.permute.xlu1 %745 }
 0x173   : > { %v752_v13 = vsel %vm749_vm12, %v746_v0, %v748_v1  ;;  %v2945_v1 = vld [vmem:[%s3832_s4 + $0x8] sm:$0xff]  }
 0x174   : > { %v798_v29 = vpop.permute.xlu0 %797 }
 0x176   : > { %v744_v2 = vpop.permute.xlu1 %743 }
 0x177   : > { %v751_v5 = vsel %vm749_vm12, %v744_v2, %v746_v0  ;;  %v2943_v0 = vld [vmem:[%s3832_s4] sm:$0xff]  }
 0x178   : > { %811 = vrot.lane.b32.xlu1 %v751_v5, %s3163_s13 }
 0x17a   : > { %v742_v7 = vpop.permute.xlu1 %741 }
 0x17b   : > { %v750_v8 = vsel %vm749_vm12, %v742_v7, %v744_v2  ;;  %v3494_v2 = vld [vmem:[%s3836_s8] sm:$0xff]  }
 0x17c   : > { %809 = vrot.lane.b32.xlu1 %v750_v8, %s3163_s13 }
 0x17e   : > { %v721_v9 = vpop.permute.xlu1 %720 }
 0x17f   : > { %805 = vrot.lane.b32.xlu0 %v721_v9, %s3163_s13  ;;  %v724_v10 = vsel %vm722_vm13, %v719_v6, %v721_v9 }
 0x180   : > { %803 = vrot.lane.b32.xlu1 %v724_v10, %s3163_s13 }
 0x182   : > { %v796_v27 = vpop.permute.xlu1 %795 }
 0x183   : > { %813 = vrot.lane.b32.xlu0 %v752_v13, %s3163_s13  ;;  %v818_v51 = vsel %vm815_vm15, %v796_v27, %v798_v29 }
 0x184   : > { %801 = vrot.lane.b32.xlu1 %v723_v14, %s3163_s13 }
 0x187   : > { %807 = vrot.lane.b32.xlu0 %v742_v7, %s3163_s13 }
 0x188   : > { %793 = vrot.lane.b32.xlu1 %v2936_v15, %s3163_s13 }
 0x18b   : > { %799 = vrot.lane.b32.xlu0 %v717_v11, %s3163_s13 }
 0x18c   : > { %773 = vperm.xlu1 %2926, %v759_v21  }
 0x18f   : > { %791 = vrot.lane.b32.xlu0 %v2938_v16, %s3163_s13  ;;  %s2709_s13 = sshll.u32 %s2436_s28, 7 }
 0x190   : > { %1112 = vperm.xlu1 %2926, %v1098_v23   ;;  %s3776_s19 = scalar_lea.hbm %s3869_s30, %s2709_s13 }
 0x193   : > { %778 = vperm.xlu0 %2925, %v760_v17  }
 0x194   : > { %763 = vperm.xlu1 %2926, %v757_v24  }
 0x197   : > { %1117 = vperm.xlu0 %2925, %v1099_v18  }
 0x198   : > { %1102 = vperm.xlu1 %2926, %v1096_v25  }
 0x19b   : > { %768 = vperm.xlu0 %2925, %v758_v19  }
 0x19c   : > { %1193 = vperm.xlu1 %2926, %v1187_v26  }
 0x19f   : > { %1107 = vperm.xlu0 %2925, %v1097_v20  }
 0x1a3   : > { %1198 = vperm.xlu0 %2925, %v1188_v22  }
 0x1ea   : > { %v812_v28 = vpop.permute.xlu1 %811 }
 0x1ee   : > { %v810_v31 = vpop.permute.xlu1 %809 }
 0x1ef   : > { %v823_v36 = vsel %vm815_vm15, %v810_v31, %v812_v28 }
 0x1f0   : > { %851 = vmatprep.subr.bf16.mxu0 %v823_v36 }
 0x1f1   : > { %v806_v37 = vpop.permute.xlu0 %805 }
 0x1f2   : > { %v804_v38 = vpop.permute.xlu1 %803 }
 0x1f3   : > { %v821_v43 = vsel %vm815_vm15, %v804_v38, %v806_v37 }
 0x1f5   : > { %v814_v39 = vpop.permute.xlu0 %813 }
 0x1f6   : > { %v802_v41 = vpop.permute.xlu1 %801  ;;  %v824_v42 = vsel %vm815_vm15, %v812_v28, %v814_v39 }
 0x1f7   : > { %2766 = vmatprep.subr.bf16.mxu1 %v824_v42  ;;  %v820_v49 = vsel %vm815_vm15, %v802_v41, %v804_v38 }
 0x1f8   : > { %2767 = vmatpush3.bf16.msra.mxu1 %v824_v42 }
 0x1f9   : > { %v808_v44 = vpop.permute.xlu0 %807  ;;  %2768 = vmatprep.subr.bf16.mxu1 %v821_v43 }
 0x1fa   : > { %v822_v48 = vsel %vm815_vm15, %v808_v44, %v810_v31  ;;  %v794_v50 = vpop.permute.xlu1 %793 }
 0x1fb   : > { %852 = vmatpush1.bf16.msra.mxu0 %v822_v48  ;;  %v817_v57 = vsel %vm815_vm15, %v794_v50, %v796_v27 }
 0x1fc   : > { %853 = vmatprep.subr.bf16.mxu0 %v820_v49  ;;  %2769 = vmatpush3.bf16.msra.mxu1 %v821_v43 }
 0x1fd   : > { %v800_v53 = vpop.permute.xlu0 %799  ;;  %2770 = vmatprep.subr.bf16.mxu1 %v818_v51 }
 0x1fe   : > { %v819_v56 = vsel %vm815_vm15, %v800_v53, %v802_v41 }
 0x1ff   : > { %854 = vmatpush1.bf16.msra.mxu0 %v819_v56 }
 0x200   : > { %855 = vmatprep.subr.bf16.mxu0 %v817_v57  ;;  %2771 = vmatpush3.bf16.msra.mxu1 %v818_v51 }
 0x201   : > { %v792_v60 = vpop.permute.xlu0 %791  ;;  %2584 = vmatprep.subr.msk.bf16.mxu1 %vm972_vm1, %v3449_v54 }
 0x202   : > { %v816_v62 = vsel %vm815_vm15, %v792_v60, %v794_v50 }
 0x203   : > { %856 = vmatpush1.bf16.msra.mxu0 %v816_v62  ;;  %2773 = vmatmul.mubr.msk.bf16.vlgmr.msra.gmra.mxu1 %vm834_vm14, %v2940_v58 }
 0x204   : > { %997 = vmatpush1.bf16.msra.mxu1 %v3462_v61  ;;  %1014 = vmatprep.mubr.bf16.mxu1 %v3159_v4 }
 0x205   : > { %2838 = vmatprep.subr.msk.bf16.mxu0 %vm972_vm1, %v3457_v59 }
 0x206   : > { %2575 = vmatmul.mubr.msk.bf16.vlgmr.msra.gmra.mxu0 %vm834_vm14, %v3401_v12 }
 0x207   : > { %883 = vmatprep.mubr.bf16.mxu0 %v3159_v4  ;;  %2777 = vmatpush3.bf16.msra.mxu0 %v3470_v63  ;;  %v774_v14 = vpop.permute.xlu1 %773 }
 0x20b   : > { %2585 = vmatmul.mubr.msk.bf16.vlgmr.msra.gmra.mxu1 %vm965_vm3, %v2943_v0  ;;  %v1113_v23 = vpop.permute.xlu1 %1112 }
 0x20c   : > { %1024 = vmatprep.mubr.bf16.mxu1 %v3159_v4 }
 0x20e   : > { %2576 = vmatmul.mubr.msk.bf16.gmra.mxu0 %vm834_vm14, %v2940_v58  ;;  %v779_v19 = vpop.permute.xlu0 %778 }
 0x20f   : > { %2778 = vmatprep.mubr.msk.bf16.mxu0 %vm965_vm3, %v2943_v0  ;;  %v764_v50 = vpop.permute.xlu1 %763 }
 0x212   : > { %v1118_v39 = vpop.permute.xlu0 %1117 }
 0x213   : > { %2586 = vmatmul.mubr.msk.bf16.gmra.mxu1 %vm965_vm3, %v2945_v1 }
 0x214   : > { %2784 = vmatprep.mubr.msk.bf16.mxu1 %vm1221_vm4, %v3494_v2 }
 0x216   : > { %2779 = vmatmul.mubr.msk.bf16.vlgmr.msra.gmra.mxu0 %vm965_vm3, %v2945_v1 }
 0x217   : > { %1260 = vmatprep.mubr.bf16.mxu0 %v3159_v4 }
 0x2c3   : > { %v2774_v5 = vpop.f32.mrf.mxu1 }
 0x2c4   : > { %v937_v28 = vadd.f32 %v2774_v5, %v774_v14 }
 0x2c5   : > { %v3498_v6 = vpop.f32.mrf.mxu1 }
 0x2c6   : > { %v875_v7 = vpop.f32.mrf.mxu0 }
 0x2c7   : > { %v2775_v8 = vpop.f32.mrf.mxu1  ;;  %v876_v1 = vadd.f32 %v875_v7, %v764_v50 }
 0x2c8   : > { %v877_v9 = vpop.f32.mrf.mxu0  ;;  %v940_v51 = vadd.f32 %v2775_v8, %v779_v19 }
 0x2c9   : > { %v3500_v10 = vpop.f32.mrf.mxu1 }
 0x2ca   : > { %v879_v11 = vpop.f32.mrf.mxu0 }
 0x2cb   : > { %v1016_v12 = vpop.f32.mrf.mxu1 }
 0x2cc   : > { %v881_v13 = vpop.f32.mrf.mxu0 }
 0x2cd   : > { %v1018_v15 = vpop.f32.mrf.mxu1 }
 0x2ce   : > { %v885_v16 = vpop.f32.mrf.mxu0 }
 0x2cf   : > { %v1020_v17 = vpop.f32.mrf.mxu1  ;;  %v886_v21 = vadd.f32 %v885_v16, %v774_v14  ;;  %v769_v16 = vpop.permute.xlu0 %768 }
 0x2d0   : > { %v887_v18 = vpop.f32.mrf.mxu0 }
 0x2d1   : > { %v1022_v20 = vpop.f32.mrf.mxu1  ;;  %v888_v25 = vadd.f32 %v887_v18, %v774_v14  ;;  %v878_v18 = vadd.f32 %v877_v9, %v764_v50 }
 0x2d2   : > { %v889_v22 = vpop.f32.mrf.mxu0 }
 0x2d3   : > { %v1026_v24 = vpop.f32.mrf.mxu1  ;;  %v890_v31 = vadd.f32 %v889_v22, %v779_v19  ;;  %v880_v22 = vadd.f32 %v879_v11, %v769_v16 }
 0x2d4   : > { %v1090_v26 = vadd.f32 %v1026_v24, %v886_v21  ;;  %v891_v27 = vpop.f32.mrf.mxu0  ;;  %v1084_v24 = vadd.f32 %v1016_v12, %v876_v1 }
 0x2d5   : > { %v1028_v29 = vpop.f32.mrf.mxu1  ;;  %v892_v44 = vadd.f32 %v891_v27, %v779_v19  ;;  %v882_v19 = vadd.f32 %v881_v13, %v769_v16  ;;  %v1087_v27 = vadd.f32 %v1020_v17, %v880_v22 }
 0x2d6   : > { %v1126_v36 = vadd.f32 %v1113_v23, %v1090_v26  ;;  %v1091_v37 = vadd.f32 %v1028_v29, %v888_v25  ;;  %v2780_v38 = vpop.f32.mrf.mxu0  ;;  %v1085_v25 = vadd.f32 %v1018_v15, %v878_v18  ;;  %v932_v29 = vadd.f32 %v3500_v10, %v769_v16 }
 0x2d7   : > { %v1092_v41 = vadd.f32 %v2780_v38, %v937_v28  ;;  %v1030_v42 = vpop.f32.mrf.mxu1  ;;  %v929_v28 = vadd.f32 %v3498_v6, %v764_v50 }
 0x2d8   : > { %v2589_v43 = vmul.f32 -1.442695, %v1126_v36  ;;  %v1127_v45 = vadd.f32 %v1113_v23, %v1091_v37  ;;  %v1093_v48 = vadd.f32 %v1030_v42, %v890_v31  ;;  %v1069_v49 = vpop.f32.mrf.mxu0  ;;  %v1088_v31 = vadd.f32 %v1022_v20, %v882_v19  ;;  %v1108_v37 = vpop.permute.xlu0 %1107 }
 0x2d9   : > { %v1128_v53 = vadd.f32 %v1113_v23, %v1092_v41  ;;  %v1032_v55 = vpop.f32.mrf.mxu1  ;;  %v1103_v23 = vpop.permute.xlu1 %1102  ;;  %v1086_v36 = vadd.f32 %v1069_v49, %v929_v28  ;;  %v1123_v38 = vadd.f32 %v1108_v37, %v1087_v27 }
 0x2da   : > { %2973 = vpow2.f32 %v2589_v43  ;;  %v2590_v56 = vmul.f32 -1.442695, %v1127_v45  ;;  %v1129_v57 = vadd.f32 %v1118_v39, %v1093_v48  ;;  %v1094_v58 = vadd.f32 %v1032_v55, %v892_v44  ;;  %v2781_v60 = vpop.f32.mrf.mxu0 }
 0x2db   : > { %v2591_v62 = vmul.f32 -1.442695, %v1128_v53  ;;  %v1095_v0 = vadd.f32 %v2781_v60, %v940_v51  ;;  %v1120_v9 = vadd.f32 %v1103_v23, %v1084_v24  ;;  %v1121_v11 = vadd.f32 %v1103_v23, %v1085_v25 }
 0x2dc   : > { %2975 = vpow2.f32 %v2590_v56  ;;  %v2592_v5 = vmul.f32 -1.442695, %v1129_v57  ;;  %v1130_v14 = vadd.f32 %v1118_v39, %v1094_v58  ;;  %v1072_v7 = vpop.f32.mrf.mxu0  ;;  %v1122_v13 = vadd.f32 %v1103_v23, %v1086_v36 }
 0x2dd   : > { %2977 = vpow2.f32 %v2591_v62  ;;  %v1131_v21 = vadd.f32 %v1118_v39, %v1095_v0  ;;  %v1089_v12 = vadd.f32 %v1072_v7, %v932_v29  ;;  %v1124_v39 = vadd.f32 %v1108_v37, %v1088_v31  ;;  %v1194_v27 = vpop.permute.xlu1 %1193 }
 0x2de   : > { %2979 = vpow2.f32 %v2592_v5  ;;  %v2593_v8 = vmul.f32 -1.442695, %v1130_v14 }
 0x2df   : > { %v2594_v26 = vmul.f32 -1.442695, %v1131_v21  ;;  %v1125_v17 = vadd.f32 %v1108_v37, %v1089_v12 }
 0x2e0   : > { %2981 = vpow2.f32 %v2593_v8 }
 0x2e1   : > { %2983 = vpow2.f32 %v2594_v26  ;;  %v2947_v26 = vld [vmem:[%s3836_s8 + $0x8] sm:$0xff]  }
 0x2e2   : > { %2985 = vtanh.f32 %v1120_v9 }
 0x2e3   : > { %2987 = vtanh.f32 %v1121_v11  ;;  %v1199_v11 = vpop.permute.xlu0 %1198 }
 0x2e4   : > { %2989 = vtanh.f32 %v1123_v38 }
 0x2e5   : > { %2991 = vtanh.f32 %v1124_v39 }
 0x2e6   : > { %2993 = vtanh.f32 %v1122_v13 }
 0x2e7   : > { %v2974_v15 = vpop.eup %2973  ;;  %2995 = vtanh.f32 %v1125_v17 }
 0x2e8   : > { %v1156_v6 = vadd.f32 1.0, %v2974_v15 }
 0x2e9   : > { %v2976_v41 = vpop.eup %2975 }
 0x2ea   : > { %v2978_v42 = vpop.eup %2977  ;;  %v1157_v10 = vadd.f32 1.0, %v2976_v41  ;;  %2997 = vrcp.f32 %v1156_v6 }
 0x2eb   : > { %v2980_v20 = vpop.eup %2979  ;;  %v1158_v43 = vadd.f32 1.0, %v2978_v42 }
 0x2ec   : > { %v1159_v44 = vadd.f32 1.0, %v2980_v20  ;;  %2999 = vrcp.f32 %v1157_v10 }
 0x2ed   : > { %v2982_v45 = vpop.eup %2981 }
 0x2ee   : > { %v2984_v48 = vpop.eup %2983  ;;  %3001 = vrcp.f32 %v1159_v44  ;;  %v1160_v49 = vadd.f32 1.0, %v2982_v45 }
 0x2ef   : > { %3003 = vrcp.f32 %v1158_v43  ;;  %v1161_v50 = vadd.f32 1.0, %v2984_v48  ;;  %v2986_v51 = vpop.eup %2985 }
 0x2f0   : > { %3005 = vrcp.f32 %v1160_v49  ;;  %v2988_v53 = vpop.eup %2987 }
 0x2f1   : > { %3007 = vrcp.f32 %v1161_v50  ;;  %v2990_v55 = vpop.eup %2989 }
 0x2f2   : > { %v2992_v56 = vpop.eup %2991 }
 0x2f3   : > { %v2994_v57 = vpop.eup %2993 }
 0x2f4   : > { %v2996_v58 = vpop.eup %2995 }
 0x2f7   : > { %v2998_v60 = vpop.eup %2997 }
 0x2f8   : > { %v1174_v22 = vmul.f32 %v2998_v60, %v2986_v51 }
 0x2f9   : > { %v3000_v62 = vpop.eup %2999 }
 0x2fa   : > { %v1175_v18 = vmul.f32 %v3000_v62, %v2988_v53  ;;  %v2948_v53 = vld [vmem:[#allocation2 + $0x10] ss:$20 sps:$4 sm:$0xff]  }
 0x2fb   : > { %v3002_v0 = vpop.eup %3001  ;;  %1435 = vrot.lane.b32.xlu1 %v2948_v53, %s3164_s20 }
 0x2fc   : > { %v3004_v1 = vpop.eup %3003  ;;  %v1177_v14 = vmul.f32 %v3002_v0, %v2990_v55 }
 0x2fd   : > { %v3006_v5 = vpop.eup %3005  ;;  %v1176_v24 = vmul.f32 %v3004_v1, %v2994_v57 }
 0x2fe   : > { %v3008_v16 = vpop.eup %3007  ;;  %v1178_v21 = vmul.f32 %v3006_v5, %v2992_v56  ;;  %v1180_v23 = vpack.c.bf16 %v1177_v14, %v1174_v22 }
 0x2ff   : > { %v1179_v8 = vmul.f32 %v3008_v16, %v2996_v58 }
 0x300   : > { %v1181_v19 = vpack.c.bf16 %v1178_v21, %v1175_v18 }
 0x301   : > { %v1182_v25 = vpack.c.bf16 %v1179_v8, %v1176_v24  ;;  %v3564_v24 = vld [vmem:[%s3834_s6 + $0x10] sm:$0xff]  }
 0x302   : > { %1242 = vmatprep.subr.bf16.mxu0 %v1181_v19 }
 0x303   : > { %1243 = vmatpush1.bf16.msra.mxu0 %v1180_v23  ;;  %2782 = vmatprep.subr.bf16.mxu1 %v1182_v25 }
 0x304   : > { %2783 = vmatpush3.bf16.msra.mxu1 %v1182_v25 }
 0x306   : > { %2597 = vmatmul.mubr.msk.bf16.vlgmr.msra.gmra.mxu0 %vm1221_vm4, %v3494_v2 }
 0x307   : > { %2785 = vmatmul.mubr.msk.bf16.vlgmr.msra.gmra.mxu1 %vm1221_vm4, %v2947_v26  ;;  %1270 = vmatprep.mubr.bf16.mxu0 %v3159_v4 }
 0x308   : > { %1562 = vmatprep.mubr.bf16.mxu1 %v3159_v4 }
 0x30e   : > { %2598 = vmatmul.mubr.msk.bf16.gmra.mxu0 %vm1221_vm4, %v2947_v26  ;;  %v2957_v26 = vld [vmem:[#allocation2] ss:$20 sps:$4 sm:$0xff]  }
 0x30f   : > { %2794 = vmatprep.mubr.msk.bf16.mxu0 %vm834_vm14, %v3564_v24 }
 0x36d   : > { %v1436_v62 = vpop.permute.xlu1 %1435 }
 0x3c6   : > { %v1262_v28 = vpop.f32.mrf.mxu0 }
 0x3c7   : > { %v1263_v7 = vadd.f32 %v1262_v28, %v1194_v27  ;;  %v2786_v29 = vpop.f32.mrf.mxu1  ;;  %v2623_v28 = vld [vmem:[%s3835_s7 + $0x38] sm:$0xff] }
 0x3c8   : > { %v1264_v31 = vpop.f32.mrf.mxu0  ;;  %v2644_v29 = vld [vmem:[%s3833_s5 + $0x38] sm:$0xff] }
 0x3c9   : > { %v3514_v9 = vadd.f32 %v1263_v7, %v3352_v33  ;;  %v1265_v36 = vadd.f32 %v1264_v31, %v1194_v27  ;;  %v1313_v37 = vpop.f32.mrf.mxu1  ;;  %v2643_v7 = vld [vmem:[%s3833_s5 + $0x30] sm:$0xff]  ;;  %v2620_v31 = vld [vmem:[%s3835_s7 + $0x20] sm:$0xff] }
 0x3ca   : > { %v1314_v2 = vadd.f32 %v1313_v37, %v1194_v27  ;;  %v1266_v12 = vpop.f32.mrf.mxu0  ;;  %v2622_v27 = vld [vmem:[%s3835_s7 + $0x30] sm:$0xff]  ;;  %v2641_v37 = vld [vmem:[%s3833_s5 + $0x20] sm:$0xff] }
 0x3cb   : > { %v3517_v38 = vadd.f32 %v1265_v36, %v3363_v40  ;;  %v1267_v39 = vadd.f32 %v1266_v12, %v1199_v11  ;;  %v2787_v13 = vpop.f32.mrf.mxu1  ;;  %v1334_v6 = vsel %vm3348_vm10, %v3514_v9, 0.0  ;;  %v2621_v36 = vld [vmem:[%s3835_s7 + $0x28] sm:$0xff] }
 0x3cc   : > { %v3520_v15 = vadd.f32 %v1314_v2, %v3354_v34  ;;  %v1268_v17 = vpop.f32.mrf.mxu0  ;;  %v2655_v2 = vld [vmem:[%s3837_s9 + $0x20] sm:$0xff] }
 0x3cd   : > { %v1335_v33 = vsel %vm3356_vm11, %v3517_v38, 0.0  ;;  %v3529_v41 = vadd.f32 %v1267_v39, %v3371_v46  ;;  %v1269_v42 = vadd.f32 %v1268_v17, %v1199_v11  ;;  %v1316_v40 = vpop.f32.mrf.mxu1  ;;  %v2656_v39 = vld [vmem:[%s3837_s9 + $0x28] sm:$0xff] }
 0x3ce   : > { %v2716_v10 = vpack.c.bf16 %v1335_v33, %v1334_v6  ;;  %v1336_v34 = vsel %vm3344_vm9, %v3520_v15, 0.0  ;;  %v1317_v20 = vadd.f32 %v1316_v40, %v1199_v11  ;;  %v1272_v43 = vpop.f32.mrf.mxu0  ;;  %v2642_v11 = vld [vmem:[%s3833_s5 + $0x28] sm:$0xff] }
 0x3cf   : > { %v2717_v44 = vpack.c.bf16 %v1336_v34, %v1336_v34  ;;  %v3535_v45 = vadd.f32 %v1269_v42, %v3378_v52  ;;  %v1337_v46 = vsel %vm3348_vm10, %v3529_v41, 0.0 }
 0x3d0   : > { %1360 = vst [vmem:[#allocation2 + $0x4] sm:$0xff] %v2716_v10  ;;  %v3538_v48 = vadd.f32 %v1317_v20, %v3373_v47  ;;  %v3060_v56 = vpack.c.bf16 %v1337_v46, %v1334_v6  ;;  %v3604_v12 = vpop.f32.mrf.mxu0 }
 0x3d1   : > { %1361 = vst [vmem:[#allocation2 + $0xc] sm:$0xf] %v2717_v44  ;;  %v1338_v49 = vsel %vm3356_vm11, %v3535_v45, 0.0 }
 0x3d2   : > { %v2718_v50 = vpack.c.bf16 %v1338_v49, %v1337_v46  ;;  %v1339_v51 = vsel %vm3344_vm9, %v3538_v48, 0.0  ;;  %v3059_v55 = vpack.c.bf16 %v1338_v49, %v1335_v33  ;;  %v1275_v13 = vpop.f32.mrf.mxu0 }
 0x3d3   : > { %v2719_v52 = vpack.c.bf16 %v1339_v51, %v1339_v51 }
 0x3d4   : > { %1362 = vst [vmem:[#allocation2 + $0x18] sm:$0xff] %v2718_v50  ;;  %1431 = vrot.lane.b32.xlu1 %v3059_v55, %s3164_s20 }
 0x3d5   : > { %1363 = vst [vmem:[#allocation2 + $0x20] sm:$0xf] %v2719_v52 }
 0x3d8   : > { %1407 = vrot.lane.b32.xlu1 %v3059_v55, %s3161_s23 }
 0x3db   : > { %v2952_v58 = vld [vmem:[#allocation2 + $0x8] ss:$20 sps:$4 sm:$0xff]   ;;  %v2955_v25 = vld [vmem:[#allocation2 + $0x4] ss:$20 sps:$4 sm:$0xff]  }
 0x3dc   : > { %v2950_v47 = vld [vmem:[#allocation2 + $0xc] ss:$20 sps:$4 sm:$0xff]   ;;  %1405 = vrot.lane.b32.xlu1 %v3060_v56, %s3161_s23 }
 0x3dd   : > { %1433 = vrot.lane.b32.xlu0 %v2950_v47, %s3164_s20  ;;  %v2951_v57 = vld [vmem:[#allocation2 + $0xc] ss:$20 sps:$4 sm:$0xff]  }
 0x3de   : > { %v2954_v60 = vld [vmem:[#allocation2 + $0xc] ss:$20 sps:$4 sm:$0xff]  }
 0x3e0   : > { %1487 = vrot.lane.b32.xlu1 %v2954_v60, %s3165_s15 }
 0x3e1   : > { %1429 = vrot.lane.b32.xlu0 %v3060_v56, %s3164_s20 }
 0x3e5   : > { %1409 = vrot.lane.b32.xlu0 %v2951_v57, %s3161_s23  ;;  %v2959_v57 = vld [vmem:[%s3834_s6 + $0x18] sm:$0xff]  }
 0x3e9   : > { %1485 = vrot.lane.b32.xlu0 %v2952_v58, %s3165_s15 }
 0x446   : > { %v1432_v1 = vpop.permute.xlu1 %1431 }
 0x44a   : > { %v1408_v16 = vpop.permute.xlu1 %1407 }
 0x44e   : > { %v1406_v19 = vpop.permute.xlu1 %1405 }
 0x44f   : > { %v1434_v0 = vpop.permute.xlu0 %1433  ;;  %v1411_v23 = vsel %vm749_vm12, %v1406_v19, %v1408_v16 }
 0x450   : > { %v1439_v14 = vsel %vm1437_vm5, %v1432_v1, %v1434_v0  ;;  %v1440_v22 = vsel %vm1437_vm5, %v1434_v0, %v1436_v62  ;;  %v2960_v62 = vld [vmem:[%s3832_s4 + $0x10] sm:$0xff]  }
 0x451   : > { %1501 = vrot.lane.b32.xlu0 %v1439_v14, %s3165_s15 }
 0x452   : > { %v1488_v6 = vpop.permute.xlu1 %1487 }
 0x453   : > { %v1430_v5 = vpop.permute.xlu0 %1429 }
 0x454   : > { %v1438_v21 = vsel %vm1437_vm5, %v1430_v5, %v1432_v1 }
 0x455   : > { %1499 = vrot.lane.b32.xlu0 %v1438_v21, %s3165_s15 }
 0x457   : > { %v1410_v18 = vpop.permute.xlu0 %1409 }
 0x458   : > { %1495 = vrot.lane.b32.xlu1 %v1410_v18, %s3165_s15  ;;  %v1412_v8 = vsel %vm749_vm12, %v1408_v16, %v1410_v18 }
 0x459   : > { %1493 = vrot.lane.b32.xlu0 %v1412_v8, %s3165_s15 }
 0x45b   : > { %v1486_v17 = vpop.permute.xlu0 %1485 }
 0x45c   : > { %1503 = vrot.lane.b32.xlu1 %v1440_v22, %s3165_s15  ;;  %v1508_v52 = vsel %vm1505_vm6, %v1486_v17, %v1488_v6 }
 0x45d   : > { %1491 = vrot.lane.b32.xlu0 %v1411_v23, %s3165_s15 }
 0x460   : > { %1497 = vrot.lane.b32.xlu1 %v1430_v5, %s3165_s15 }
 0x461   : > { %1483 = vrot.lane.b32.xlu0 %v2955_v25, %s3165_s15 }
 0x464   : > { %1489 = vrot.lane.b32.xlu1 %v1406_v19, %s3165_s15 }
 0x465   : > { %1463 = vperm.xlu0 %2925, %v2622_v27  }
 0x468   : > { %1481 = vrot.lane.b32.xlu1 %v2957_v26, %s3165_s15  ;;  %s3168_s15 = smov [#allocation3]  }
 0x469   : > { %1784 = vperm.xlu0 %2925, %v2643_v7   ;;  %s3067_s23 = sshll.u32 %s3168_s15, 4  ;;  %s3068_s23 = int_to_ptr.vmem [resolvable:$false] %s3067_s23 }
 0x46a   : > { %s3069_s18 = scalar_lea.vmem %s3068_s23, 256 }
 0x46c   : > { %1468 = vperm.xlu1 %2926, %v2623_v28  }
 0x46d   : > { %1453 = vperm.xlu0 %2925, %v2620_v31  }
 0x470   : > { %1789 = vperm.xlu1 %2926, %v2644_v29  }
 0x471   : > { %1774 = vperm.xlu0 %2925, %v2641_v37  }
 0x474   : > { %1458 = vperm.xlu1 %2926, %v2621_v36  }
 0x475   : > { %1867 = vperm.xlu0 %2925, %v2655_v2  }
 0x478   : > { %1779 = vperm.xlu1 %2926, %v2642_v11  }
 0x47c   : > { %1872 = vperm.xlu1 %2926, %v2656_v39  }
 0x4c3   : > { %v1502_v33 = vpop.permute.xlu0 %1501 }
 0x4c7   : > { %v1500_v40 = vpop.permute.xlu0 %1499 }
 0x4c8   : > { %v1513_v10 = vsel %vm1505_vm6, %v1500_v40, %v1502_v33 }
 0x4c9   : > { %1540 = vmatprep.subr.bf16.mxu1 %v1513_v10 }
 0x4ca   : > { %v1496_v42 = vpop.permute.xlu1 %1495 }
 0x4cb   : > { %v1494_v20 = vpop.permute.xlu0 %1493 }
 0x4cc   : > { %v1511_v44 = vsel %vm1505_vm6, %v1494_v20, %v1496_v42 }
 0x4ce   : > { %v1504_v34 = vpop.permute.xlu1 %1503 }
 0x4cf   : > { %v1514_v43 = vsel %vm1505_vm6, %v1502_v33, %v1504_v34  ;;  %v1492_v50 = vpop.permute.xlu0 %1491 }
 0x4d0   : > { %2788 = vmatprep.subr.bf16.mxu0 %v1514_v43  ;;  %v1510_v51 = vsel %vm1505_vm6, %v1492_v50, %v1494_v20 }
 0x4d1   : > { %2789 = vmatpush3.bf16.msra.mxu0 %v1514_v43 }
 0x4d2   : > { %v1498_v46 = vpop.permute.xlu1 %1497  ;;  %2790 = vmatprep.subr.bf16.mxu0 %v1511_v44 }
 0x4d3   : > { %v1512_v49 = vsel %vm1505_vm6, %v1498_v46, %v1500_v40  ;;  %v1484_v55 = vpop.permute.xlu0 %1483 }
 0x4d4   : > { %1541 = vmatpush1.bf16.msra.mxu1 %v1512_v49  ;;  %v1507_v56 = vsel %vm1505_vm6, %v1484_v55, %v1486_v17 }
 0x4d5   : > { %1542 = vmatprep.subr.bf16.mxu1 %v1510_v51  ;;  %2791 = vmatpush3.bf16.msra.mxu0 %v1511_v44 }
 0x4d6   : > { %v1490_v53 = vpop.permute.xlu1 %1489  ;;  %2792 = vmatprep.subr.bf16.mxu0 %v1508_v52 }
 0x4d7   : > { %v1509_v47 = vsel %vm1505_vm6, %v1490_v53, %v1492_v50 }
 0x4d8   : > { %1543 = vmatpush1.bf16.msra.mxu1 %v1509_v47 }
 0x4d9   : > { %1544 = vmatprep.subr.bf16.mxu1 %v1507_v56  ;;  %2793 = vmatpush3.bf16.msra.mxu0 %v1508_v52 }
 0x4da   : > { %v1482_v58 = vpop.permute.xlu1 %1481  ;;  %2636 = vmatprep.subr.msk.bf16.mxu0 %vm972_vm1, %v3449_v54 }
 0x4db   : > { %v1506_v60 = vsel %vm1505_vm6, %v1482_v58, %v1484_v55 }
 0x4dc   : > { %1545 = vmatpush1.bf16.msra.mxu1 %v1506_v60  ;;  %2795 = vmatmul.mubr.msk.bf16.vlgmr.msra.gmra.mxu0 %vm834_vm14, %v2959_v57 }
 0x4dd   : > { %1668 = vmatpush1.bf16.msra.mxu0 %v3462_v61  ;;  %1685 = vmatprep.mubr.bf16.mxu0 %v3159_v4  ;;  %v3648_v61 = vld [vmem:[%s3836_s8 + $0x10] sm:$0xff]  }
 0x4de   : > { %2839 = vmatprep.subr.msk.bf16.mxu1 %vm972_vm1, %v3457_v59  ;;  %v2961_v59 = vld [vmem:[%s3832_s4 + $0x18] sm:$0xff]  }
 0x4df   : > { %2626 = vmatmul.mubr.msk.bf16.vlgmr.msra.gmra.mxu1 %vm834_vm14, %v3564_v24 }
 0x4e0   : > { %1572 = vmatprep.mubr.bf16.mxu1 %v3159_v4  ;;  %2799 = vmatpush3.bf16.msra.mxu1 %v3470_v63  ;;  %v3652_v63 = vpop.f32.mrf.mxu0  ;;  %v1464_v23 = vpop.permute.xlu0 %1463 }
 0x4e4   : > { %2637 = vmatmul.mubr.msk.bf16.vlgmr.msra.gmra.mxu0 %vm965_vm3, %v2960_v62  ;;  %v1785_v2 = vpop.permute.xlu0 %1784 }
 0x4e5   : > { %1695 = vmatprep.mubr.bf16.mxu0 %v3159_v4 }
 0x4e7   : > { %2627 = vmatmul.mubr.msk.bf16.gmra.mxu1 %vm834_vm14, %v2959_v57  ;;  %v1469_v27 = vpop.permute.xlu1 %1468 }
 0x4e8   : > { %2800 = vmatprep.mubr.msk.bf16.mxu1 %vm965_vm3, %v2960_v62  ;;  %v1454_v57 = vpop.permute.xlu0 %1453 }
 0x4eb   : > { %v1790_v40 = vpop.permute.xlu1 %1789 }
 0x4ec   : > { %2638 = vmatmul.mubr.msk.bf16.gmra.mxu0 %vm965_vm3, %v2961_v59 }
 0x4ed   : > { %2806 = vmatprep.mubr.msk.bf16.mxu0 %vm1221_vm4, %v3648_v61 }
 0x4ef   : > { %2801 = vmatmul.mubr.msk.bf16.vlgmr.msra.gmra.mxu1 %vm965_vm3, %v2961_v59 }
 0x4f0   : > { %1933 = vmatprep.mubr.bf16.mxu1 %v3159_v4 }
 0x59c   : > { %v2796_v0 = vpop.f32.mrf.mxu0 }
 0x59d   : > { %v1626_v39 = vadd.f32 %v2796_v0, %v1464_v23 }
 0x59e   : > { %v1617_v1 = vpop.f32.mrf.mxu0 }
 0x59f   : > { %v1564_v5 = vpop.f32.mrf.mxu1 }
 0x5a0   : > { %v2797_v14 = vpop.f32.mrf.mxu0  ;;  %v1565_v62 = vadd.f32 %v1564_v5, %v1454_v57 }
 0x5a1   : > { %v1566_v16 = vpop.f32.mrf.mxu1  ;;  %v1629_v50 = vadd.f32 %v2797_v14, %v1469_v27 }
 0x5a2   : > { %v3654_v18 = vpop.f32.mrf.mxu0 }
 0x5a3   : > { %v1568_v21 = vpop.f32.mrf.mxu1 }
 0x5a4   : > { %v1687_v22 = vpop.f32.mrf.mxu0 }
 0x5a5   : > { %v1570_v24 = vpop.f32.mrf.mxu1  ;;  %v1755_v14 = vadd.f32 %v1687_v22, %v1565_v62 }
 0x5a6   : > { %v1689_v8 = vpop.f32.mrf.mxu0 }
 0x5a7   : > { %v1574_v19 = vpop.f32.mrf.mxu1 }
 0x5a8   : > { %v1691_v25 = vpop.f32.mrf.mxu0  ;;  %v1575_v7 = vadd.f32 %v1574_v19, %v1464_v23  ;;  %v1459_v19 = vpop.permute.xlu1 %1458 }
 0x5a9   : > { %v1576_v26 = vpop.f32.mrf.mxu1  ;;  %v1621_v5 = vadd.f32 %v3654_v18, %v1459_v19 }
 0x5aa   : > { %v1693_v28 = vpop.f32.mrf.mxu0  ;;  %v1577_v36 = vadd.f32 %v1576_v26, %v1464_v23  ;;  %v1567_v23 = vadd.f32 %v1566_v16, %v1454_v57 }
 0x5ab   : > { %v1578_v29 = vpop.f32.mrf.mxu1 }
 0x5ac   : > { %v1697_v31 = vpop.f32.mrf.mxu0  ;;  %v1579_v17 = vadd.f32 %v1578_v29, %v1469_v27  ;;  %v1571_v29 = vadd.f32 %v1570_v24, %v1459_v19 }
 0x5ad   : > { %v1761_v37 = vadd.f32 %v1697_v31, %v1575_v7  ;;  %v1580_v11 = vpop.f32.mrf.mxu1  ;;  %v1569_v7 = vadd.f32 %v1568_v21, %v1459_v19  ;;  %v1756_v31 = vadd.f32 %v1689_v8, %v1567_v23 }
 0x5ae   : > { %v1699_v13 = vpop.f32.mrf.mxu0  ;;  %v1581_v43 = vadd.f32 %v1580_v11, %v1469_v27 }
 0x5af   : > { %v1798_v6 = vadd.f32 %v1785_v2, %v1761_v37  ;;  %v1762_v33 = vadd.f32 %v1699_v13, %v1577_v36  ;;  %v2802_v42 = vpop.f32.mrf.mxu1  ;;  %v1618_v37 = vadd.f32 %v1617_v1, %v1454_v57  ;;  %v1758_v11 = vadd.f32 %v1691_v25, %v1569_v7 }
 0x5b0   : > { %v1763_v10 = vadd.f32 %v2802_v42, %v1626_v39  ;;  %v1701_v34 = vpop.f32.mrf.mxu0  ;;  %v1775_v39 = vpop.permute.xlu0 %1774  ;;  %v1759_v13 = vadd.f32 %v1693_v28, %v1571_v29 }
 0x5b1   : > { %v2645_v20 = vmul.f32 -1.442695, %v1798_v6  ;;  %v1799_v44 = vadd.f32 %v1785_v2, %v1762_v33  ;;  %v1764_v46 = vadd.f32 %v1701_v34, %v1579_v17  ;;  %v1740_v49 = vpop.f32.mrf.mxu1  ;;  %v1792_v17 = vadd.f32 %v1775_v39, %v1755_v14  ;;  %v1780_v6 = vpop.permute.xlu1 %1779 }
 0x5b2   : > { %v1800_v51 = vadd.f32 %v1785_v2, %v1763_v10  ;;  %v1703_v52 = vpop.f32.mrf.mxu0  ;;  %v1757_v16 = vadd.f32 %v1740_v49, %v1618_v37  ;;  %v1793_v33 = vadd.f32 %v1775_v39, %v1756_v31  ;;  %v1795_v22 = vadd.f32 %v1780_v6, %v1758_v11 }
 0x5b3   : > { %3009 = vpow2.f32 %v2645_v20  ;;  %v2646_v53 = vmul.f32 -1.442695, %v1799_v44  ;;  %v1801_v47 = vadd.f32 %v1790_v40, %v1764_v46  ;;  %v1765_v55 = vadd.f32 %v1703_v52, %v1581_v43  ;;  %v2803_v56 = vpop.f32.mrf.mxu1 }
 0x5b4   : > { %v2647_v58 = vmul.f32 -1.442695, %v1800_v51  ;;  %v1766_v60 = vadd.f32 %v2803_v56, %v1629_v50  ;;  %v1796_v42 = vadd.f32 %v1780_v6, %v1759_v13  ;;  %v1794_v24 = vadd.f32 %v1775_v39, %v1757_v16  ;;  %v1868_v37 = vpop.permute.xlu0 %1867 }
 0x5b5   : > { %3011 = vpow2.f32 %v2646_v53  ;;  %v2648_v59 = vmul.f32 -1.442695, %v1801_v47  ;;  %v1802_v0 = vadd.f32 %v1790_v40, %v1765_v55  ;;  %v1743_v2 = vpop.f32.mrf.mxu1 }
 0x5b6   : > { %3013 = vpow2.f32 %v2647_v58  ;;  %v1803_v26 = vadd.f32 %v1790_v40, %v1766_v60  ;;  %v1760_v21 = vadd.f32 %v1743_v2, %v1621_v5 }
 0x5b7   : > { %3015 = vpow2.f32 %v2648_v59  ;;  %v2649_v27 = vmul.f32 -1.442695, %v1802_v0 }
 0x5b8   : > { %v2650_v36 = vmul.f32 -1.442695, %v1803_v26  ;;  %v1797_v1 = vadd.f32 %v1780_v6, %v1760_v21  ;;  %v1873_v6 = vpop.permute.xlu1 %1872 }
 0x5b9   : > { %3017 = vpow2.f32 %v2649_v27 }
 0x5ba   : > { %3019 = vpow2.f32 %v2650_v36  ;;  %v2963_v36 = vld [vmem:[%s3836_s8 + $0x18] sm:$0xff]  }
 0x5bb   : > { %3021 = vtanh.f32 %v1792_v17 }
 0x5bc   : > { %3023 = vtanh.f32 %v1793_v33 }
 0x5bd   : > { %3025 = vtanh.f32 %v1795_v22 }
 0x5be   : > { %3027 = vtanh.f32 %v1796_v42 }
 0x5bf   : > { %3029 = vtanh.f32 %v1794_v24 }
 0x5c0   : > { %v3010_v8 = vpop.eup %3009  ;;  %3031 = vtanh.f32 %v1797_v1 }
 0x5c1   : > { %v1828_v25 = vadd.f32 1.0, %v3010_v8 }
 0x5c2   : > { %v3012_v40 = vpop.eup %3011 }
 0x5c3   : > { %v3014_v10 = vpop.eup %3013  ;;  %v1829_v18 = vadd.f32 1.0, %v3012_v40  ;;  %3033 = vrcp.f32 %v1828_v25 }
 0x5c4   : > { %v3016_v28 = vpop.eup %3015  ;;  %v1830_v34 = vadd.f32 1.0, %v3014_v10 }
 0x5c5   : > { %v1831_v20 = vadd.f32 1.0, %v3016_v28  ;;  %3035 = vrcp.f32 %v1829_v18 }
 0x5c6   : > { %v3018_v43 = vpop.eup %3017 }
 0x5c7   : > { %v3020_v44 = vpop.eup %3019  ;;  %3037 = vrcp.f32 %v1831_v20  ;;  %v1832_v46 = vadd.f32 1.0, %v3018_v43 }
 0x5c8   : > { %3039 = vrcp.f32 %v1830_v34  ;;  %v1833_v49 = vadd.f32 1.0, %v3020_v44  ;;  %v3022_v50 = vpop.eup %3021 }
 0x5c9   : > { %3041 = vrcp.f32 %v1832_v46  ;;  %v3024_v51 = vpop.eup %3023 }
 0x5ca   : > { %3043 = vrcp.f32 %v1833_v49  ;;  %v3026_v52 = vpop.eup %3025 }
 0x5cb   : > { %v3028_v53 = vpop.eup %3027 }
 0x5cc   : > { %v3030_v47 = vpop.eup %3029 }
 0x5cd   : > { %v3032_v55 = vpop.eup %3031 }
 0x5d0   : > { %v3034_v56 = vpop.eup %3033 }
 0x5d1   : > { %v1846_v26 = vmul.f32 %v3034_v56, %v3022_v50 }
 0x5d2   : > { %v3036_v57 = vpop.eup %3035 }
 0x5d3   : > { %v1847_v19 = vmul.f32 %v3036_v57, %v3024_v51  ;;  %v2680_v57 = vld [vmem:[%s3835_s7 + $0x50] sm:$0xff] }
 0x5d4   : > { %v3038_v58 = vpop.eup %3037 }
 0x5d5   : > { %v3040_v60 = vpop.eup %3039  ;;  %v1849_v59 = vmul.f32 %v3038_v58, %v3026_v52  ;;  %v2681_v58 = vld [vmem:[%s3835_s7 + $0x58] sm:$0xff] }
 0x5d6   : > { %v3042_v62 = vpop.eup %3041  ;;  %v1848_v7 = vmul.f32 %v3040_v60, %v3030_v47  ;;  %v2696_v60 = vld [vmem:[%s3833_s5 + $0x50] sm:$0xff] }
 0x5d7   : > { %v3044_v0 = vpop.eup %3043  ;;  %v1850_v23 = vmul.f32 %v3042_v62, %v3028_v53  ;;  %v1852_v29 = vpack.c.bf16 %v1849_v59, %v1846_v26  ;;  %v2968_v53 = vld [vmem:[%s3834_s6 + $0x20] sm:$0xff]   ;;  %v2697_v62 = vld [vmem:[%s3833_s5 + $0x58] sm:$0xff] }
 0x5d8   : > { %v1851_v14 = vmul.f32 %v3044_v0, %v3032_v55  ;;  %v2678_v59 = vld [vmem:[%s3835_s7 + $0x40] sm:$0xff]  ;;  %v2679_v0 = vld [vmem:[%s3835_s7 + $0x48] sm:$0xff] }
 0x5d9   : > { %v1853_v27 = vpack.c.bf16 %v1850_v23, %v1847_v19  ;;  %v2694_v19 = vld [vmem:[%s3833_s5 + $0x40] sm:$0xff]  ;;  %v2695_v23 = vld [vmem:[%s3833_s5 + $0x48] sm:$0xff] }
 0x5da   : > { %v1854_v31 = vpack.c.bf16 %v1851_v14, %v1848_v7  ;;  %v1189_v7 = vld [vmem:[%s3837_s9 + $0x10] sm:$0xff] }
 0x5db   : > { %1915 = vmatprep.subr.bf16.mxu1 %v1853_v27  ;;  %v1190_v27 = vld [vmem:[%s3837_s9 + $0x18] sm:$0xff] }
 0x5dc   : > { %1916 = vmatpush1.bf16.msra.mxu1 %v1852_v29  ;;  %2804 = vmatprep.subr.bf16.mxu0 %v1854_v31  ;;  %v2657_v29 = vld [vmem:[%s3837_s9 + $0x30] sm:$0xff] }
 0x5dd   : > { %2805 = vmatpush3.bf16.msra.mxu0 %v1854_v31  ;;  %2840 = vmatprep.subr.msk.bf16.mxu1 %vm972_vm1, %v3449_v54  ;;  %v2658_v31 = vld [vmem:[%s3837_s9 + $0x38] sm:$0xff] }
 0x5df   : > { %2661 = vmatmul.mubr.msk.bf16.vlgmr.msra.gmra.mxu1 %vm1221_vm4, %v3648_v61 }
 0x5e0   : > { %2807 = vmatmul.mubr.msk.bf16.vlgmr.msra.gmra.mxu0 %vm1221_vm4, %v2963_v36  ;;  %1943 = vmatprep.mubr.bf16.mxu1 %v3159_v4 }
 0x5e1   : > { %2821 = vmatpush3.bf16.msra.mxu1 %v977_v32  ;;  %2816 = vmatprep.mubr.msk.bf16.mxu0 %vm834_vm14, %v2968_v53 }
 0x5e2   : > { %2832 = vmatprep.subr.bf16.mxu1 %v3158_v3 }
 0x5e7   : > { %2662 = vmatmul.mubr.msk.bf16.gmra.mxu1 %vm1221_vm4, %v2963_v36  ;;  %v2704_v36 = vld [vmem:[%s3837_s9 + $0x40] sm:$0xff] }
 0x5e8   : > { %2822 = vmatprep.mubr.msk.bf16.mxu1 %vm965_vm3, %v2970_v30 }
 0x5ef   : > { %2823 = vmatmul.mubr.msk.bf16.vlgmr.msra.gmra.mxu1 %vm965_vm3, %v2971_v35 }
 0x5f0   : > { %2834 = vmatprep.mubr.msk.bf16.mxu1 %vm3160_vm0, %v3158_v3 }
 0x69f   : > { %v1935_v11 = vpop.f32.mrf.mxu1 }
 0x6a0   : > { %v1936_v2 = vadd.f32 %v1935_v11, %v1868_v37  ;;  %v2808_v39 = vpop.f32.mrf.mxu0  ;;  %v2374_v11 = vld [vmem:[%s3839_s11] sm:$0xff] }
 0x6a1   : > { %v1937_v5 = vpop.f32.mrf.mxu1 }
 0x6a2   : > { %v1999_v13 = vadd.f32 %v1936_v2, %v3514_v9  ;;  %v1938_v17 = vadd.f32 %v1937_v5, %v1868_v37  ;;  %v1986_v16 = vpop.f32.mrf.mxu0 }
 0x6a3   : > { %v1987_v33 = vadd.f32 %v1986_v16, %v1868_v37  ;;  %v1939_v21 = vpop.f32.mrf.mxu1  ;;  %v2705_v37 = vld [vmem:[%s3837_s9 + $0x48] sm:$0xff] }
 0x6a4   : > { %v2000_v61 = vadd.f32 %v1938_v17, %v3517_v38  ;;  %v1940_v22 = vadd.f32 %v1939_v21, %v1873_v6  ;;  %v2809_v42 = vpop.f32.mrf.mxu0  ;;  %v2007_v8 = vsel %vm3348_vm10, %v1999_v13, 0.0 }
 0x6a5   : > { %v2001_v4 = vadd.f32 %v1987_v33, %v3520_v15  ;;  %v1941_v24 = vpop.f32.mrf.mxu1  ;;  %v2969_v33 = vld [vmem:[%s3834_s6 + $0x28] sm:$0xff]  }
 0x6a6   : > { %v2008_v1 = vsel %vm3356_vm11, %v2000_v61, 0.0  ;;  %v2002_v9 = vadd.f32 %v1940_v22, %v3529_v41  ;;  %v1942_v25 = vadd.f32 %v1941_v24, %v1873_v6  ;;  %v1989_v40 = vpop.f32.mrf.mxu0 }
 0x6a7   : > { %v2720_v10 = vpack.c.bf16 %v2008_v1, %v2007_v8  ;;  %v2009_v18 = vsel %vm3344_vm9, %v2001_v4, 0.0  ;;  %v1990_v38 = vadd.f32 %v1989_v40, %v1873_v6  ;;  %v1945_v28 = vpop.f32.mrf.mxu1 }
 0x6a8   : > { %v2721_v34 = vpack.c.bf16 %v2009_v18, %v2009_v18  ;;  %v2003_v15 = vadd.f32 %v1942_v25, %v3535_v45  ;;  %v2010_v43 = vsel %vm3348_vm10, %v2002_v9, 0.0 }
 0x6a9   : > { %2033 = vst [vmem:[#allocation2 + $0x4] sm:$0xff] %v2720_v10  ;;  %v2004_v20 = vadd.f32 %v1990_v38, %v3538_v48  ;;  %v3061_v50 = vpack.c.bf16 %v2010_v43, %v2007_v8  ;;  %v3727_v26 = vpop.f32.mrf.mxu1 }
 0x6aa   : > { %2034 = vst [vmem:[#allocation2 + $0xc] sm:$0xf] %v2721_v34  ;;  %v2011_v41 = vsel %vm3356_vm11, %v2003_v15, 0.0 }
 0x6ab   : > { %v2722_v44 = vpack.c.bf16 %v2011_v41, %v2010_v43  ;;  %v2012_v46 = vsel %vm3344_vm9, %v2004_v20, 0.0  ;;  %v3062_v51 = vpack.c.bf16 %v2011_v41, %v2008_v1  ;;  %v1948_v14 = vpop.f32.mrf.mxu1 }
 0x6ac   : > { %v2723_v49 = vpack.c.bf16 %v2012_v46, %v2012_v46 }
 0x6ad   : > { %2035 = vst [vmem:[#allocation2 + $0x18] sm:$0xff] %v2722_v44  ;;  %v1949_v21 = vpop.f32.mrf.mxu1 }
 0x6ae   : > { %2036 = vst [vmem:[#allocation2 + $0x20] sm:$0xf] %v2723_v49 }
 0x6af   : > { %v2824_v22 = vpop.f32.mrf.mxu1 }
 0x6b1   : > { %v2238_v1 = vpop.f32.mrf.mxu1 }
 0x6b3   : > { %v2825_v38 = vpop.f32.mrf.mxu1 }
 0x6b4   : > { %v2966_v52 = vld [vmem:[#allocation2 + $0x8] ss:$20 sps:$4 sm:$0xff]  }
 0x6b5   : > { %v2964_v45 = vld [vmem:[#allocation2 + $0xc] ss:$20 sps:$4 sm:$0xff]   ;;  %2066 = vrot.lane.b32.xlu0 %v2966_v52, %s3166_s21  ;;  %v2967_v48 = vld [vmem:[#allocation2 + $0x8] ss:$20 sps:$4 sm:$0xff]  }
 0x6b6   : > { %2068 = vrot.lane.b32.xlu1 %v2964_v45, %s3166_s21  ;;  %s2547_s21 = sshll.u32 %s453_s26, 3 }
 0x6b7   : > { %s455_s14 = scalar_lea.vmem [#allocation3], %s2547_s21 }
 0x6b8   : > { %s2440_s17 = sshll.u32 %s455_s14, 4  ;;  %s3778_s17 = int_to_ptr.vmem [resolvable:$true] %s2440_s17 }
 0x6b9   : > { %2056 = vrot.lane.b32.xlu0 %v2967_v48, %s3164_s20  ;;  %s3167_s20 = smov 4   ;;  %s3063_s25 = scalar_lea.vmem %s3778_s17, 128 }
 0x6ba   : > { %p3064_p0 = scmp.ne.s32.totalorder %s3778_s17, %s3063_s25  ;;  %p3070_p4 = scmp.lt.s32.totalorder %s3778_s17, %s3068_s23 }
 0x6bb   : > { %p3071_p5 = scmp.lt.s32.totalorder %s3069_s18, %s3063_s25 }
 0x6bc   : > { %p3065_p1 = pnand %p3064_p0, %p3285_p3 }
 0x6bd   : > { %p3072_p6 = por %p3071_p5, %p3070_p4 }
 0x6be   : > { %p3066_p2 = pneg %p3065_p1 }
 0x6c0   : > { %p3073_p7 = pnand %p3072_p6, %p3066_p2 }
 0x727   : > { %v2067_v54 = vpop.permute.xlu0 %2066 }
 0x728   : > { %v2069_v47 = vpop.permute.xlu1 %2068  ;;  %2118 = vrot.lane.b32.xlu1 %v2067_v54, %s3167_s20 }
 0x729   : > { %v2071_v55 = vsel %vm2070_vm7, %v2067_v54, %v2069_v47 }
 0x72a   : > { %2120 = vrot.lane.b32.xlu0 %v2071_v55, %s3167_s20 }
 0x72b   : > { %v2057_v56 = vpop.permute.xlu0 %2056 }
 0x72c   : > { %2116 = vrot.lane.b32.xlu1 %v2057_v56, %s3167_s20 }
 0x72e   : > { %2112 = vrot.lane.b32.xlu0 %v3061_v50, %s3167_s20 }
 0x730   : > { %2114 = vrot.lane.b32.xlu1 %v3062_v51, %s3167_s20  ;;  %v2241_v51 = vpop.f32.mrf.mxu1 }
 0x732   : > { %2094 = vperm.xlu0 %2925, %v2680_v57  }
 0x734   : > { %2099 = vperm.xlu1 %2926, %v2681_v58  }
 0x736   : > { %2274 = vperm.xlu0 %2925, %v2696_v60  }
 0x738   : > { %2279 = vperm.xlu1 %2926, %v2697_v62  }
 0x73a   : > { %2084 = vperm.xlu0 %2925, %v2678_v59  }
 0x73c   : > { %2089 = vperm.xlu1 %2926, %v2679_v0   ;;  %v2972_v0 = vld [vmem:[%s3836_s8 + $0x20] sm:$0xff]  }
 0x73e   : > { %2264 = vperm.xlu0 %2925, %v2694_v19  }
 0x740   : > { %2269 = vperm.xlu1 %2926, %v2695_v23  }
 0x742   : > { %1203 = vperm.xlu0 %2925, %v1189_v7  }
 0x744   : > { %1208 = vperm.xlu1 %2926, %v1190_v27  }
 0x746   : > { %1877 = vperm.xlu0 %2925, %v2657_v29  }
 0x748   : > { %1882 = vperm.xlu1 %2926, %v2658_v31  }
 0x74a   : > { %2362 = vperm.xlu0 %2925, %v2704_v36  }
 0x74c   : > { %2367 = vperm.xlu1 %2926, %v2705_v37  }
 0x74e   : > { %2377 = vperm.xlu0 %2925, %v2374_v11  }
 0x79a   : > { %v2119_v2 = vpop.permute.xlu1 %2118 }
 0x79c   : > { %v2121_v39 = vpop.permute.xlu0 %2120 }
 0x79d   : > { %v2124_v5 = vsel %vm541_vm2, %v2119_v2, %v2121_v39 }
 0x79e   : > { %2810 = vmatprep.subr.bf16.mxu0 %v2124_v5  ;;  %v2117_v13 = vpop.permute.xlu1 %2116 }
 0x79f   : > { %2811 = vmatpush3.bf16.msra.mxu0 %v2124_v5 }
 0x7a0   : > { %2812 = vmatprep.subr.bf16.mxu0 %v2117_v13  ;;  %v2113_v17 = vpop.permute.xlu0 %2112 }
 0x7a2   : > { %v2115_v16 = vpop.permute.xlu1 %2114 }
 0x7a3   : > { %2813 = vmatpush3.bf16.msra.mxu0 %v2117_v13  ;;  %v2123_v6 = vsel %vm541_vm2, %v2113_v17, %v2115_v16 }
 0x7a4   : > { %2814 = vmatprep.subr.bf16.mxu0 %v2123_v6 }
 0x7a7   : > { %2815 = vmatpush3.bf16.msra.mxu0 %v2123_v6 }
 0x7a8   : > { %2826 = vmatprep.subr.bf16.mxu0 %v3158_v3 }
 0x7aa   : > { %2817 = vmatmul.mubr.msk.bf16.vlgmr.msra.gmra.mxu0 %vm834_vm14, %v2969_v33 }
 0x7ab   : > { %2828 = vmatprep.mubr.msk.bf16.mxu0 %vm3160_vm0, %v3158_v3 }
 0x7ad   : > { %v2095_v61 = vpop.permute.xlu0 %2094 }
 0x7af   : > { %v2100_v4 = vpop.permute.xlu1 %2099 }
 0x7b1   : > { %v2275_v25 = vpop.permute.xlu0 %2274 }
 0x7b3   : > { %v2280_v15 = vpop.permute.xlu1 %2279 }
 0x7b5   : > { %v2085_v43 = vpop.permute.xlu0 %2084 }
 0x7b7   : > { %v2090_v46 = vpop.permute.xlu1 %2089 }
 0x7b9   : > { %v2265_v52 = vpop.permute.xlu0 %2264 }
 0x7bb   : > { %v2270_v30 = vpop.permute.xlu1 %2269 }
 0x7bd   : > { %v1204_v19 = vpop.permute.xlu0 %1203 }
 0x7be   : > { %v1274_v29 = vadd.f32 %v3604_v12, %v1204_v19  ;;  %v2372_v12 = vld [vmem:[%s3838_s10] sm:$0xf] }
 0x7bf   : > { %v1209_v23 = vpop.permute.xlu1 %1208 }
 0x7c0   : > { %v1277_v37 = vadd.f32 %v3652_v63, %v1209_v23 }
 0x7c1   : > { %v1878_v7 = vpop.permute.xlu0 %1877 }
 0x7c2   : > { %v1947_v27 = vadd.f32 %v3727_v26, %v1878_v7 }
 0x7c3   : > { %v1883_v14 = vpop.permute.xlu1 %1882 }
 0x7c4   : > { %v1950_v31 = vadd.f32 %v1949_v21, %v1883_v14  ;;  %v2005_v11 = vadd.f32 %v1947_v27, %v1274_v29 }
 0x7c5   : > { %v2363_v17 = vpop.permute.xlu0 %2362 }
 0x7c6   : > { %v2006_v5 = vadd.f32 %v1950_v31, %v1277_v37 }
 0x7c7   : > { %v2368_v6 = vpop.permute.xlu1 %2367 }
 0x7c9   : > { %v2378_v63 = vpop.permute.xlu0 %2377 }
 0x86a   : > { %v2818_v42 = vpop.f32.mrf.mxu0 }
 0x86b   : > { %v2177_v24 = vadd.f32 %v2818_v42, %v2095_v61 }
 0x86c   : > { %v2168_v8 = vpop.f32.mrf.mxu0 }
 0x86d   : > { %v2255_v9 = vadd.f32 %v2824_v22, %v2177_v24  ;;  %v2169_v44 = vadd.f32 %v2168_v8, %v2085_v43 }
 0x86e   : > { %v2819_v40 = vpop.f32.mrf.mxu0 }
 0x86f   : > { %v2284_v10 = vadd.f32 %v2275_v25, %v2255_v9  ;;  %v2180_v18 = vadd.f32 %v2819_v40, %v2100_v4  ;;  %v2253_v50 = vadd.f32 %v2238_v1, %v2169_v44 }
 0x870   : > { %v2171_v41 = vpop.f32.mrf.mxu0 }
 0x871   : > { %v2698_v28 = vmul.f32 -1.442695, %v2284_v10  ;;  %v2256_v34 = vadd.f32 %v2825_v38, %v2180_v18  ;;  %v2172_v49 = vadd.f32 %v2171_v41, %v2090_v46  ;;  %v2282_v32 = vadd.f32 %v2265_v52, %v2253_v50 }
 0x873   : > { %3045 = vpow2.f32 %v2698_v28  ;;  %v2285_v20 = vadd.f32 %v2280_v15, %v2256_v34  ;;  %v2254_v45 = vadd.f32 %v2241_v51, %v2172_v49 }
 0x875   : > { %v2699_v3 = vmul.f32 -1.442695, %v2285_v20  ;;  %v2283_v53 = vadd.f32 %v2270_v30, %v2254_v45 }
 0x877   : > { %3047 = vpow2.f32 %v2699_v3 }
 0x878   : > { %3049 = vtanh.f32 %v2282_v32 }
 0x880   : > { %v3046_v48 = vpop.eup %3045 }
 0x881   : > { %v2294_v35 = vadd.f32 1.0, %v3046_v48 }
 0x883   : > { %3051 = vrcp.f32 %v2294_v35 }
 0x884   : > { %v3048_v47 = vpop.eup %3047  ;;  %3053 = vtanh.f32 %v2283_v53 }
 0x885   : > { %v2295_v54 = vadd.f32 1.0, %v3048_v47  ;;  %v3050_v55 = vpop.eup %3049 }
 0x887   : > { %3055 = vrcp.f32 %v2295_v54 }
 0x890   : > { %v3052_v56 = vpop.eup %3051 }
 0x891   : > { %v3054_v57 = vpop.eup %3053  ;;  %v2300_v60 = vmul.f32 %v3052_v56, %v3050_v55 }
 0x894   : > { %v3056_v58 = vpop.eup %3055 }
 0x895   : > { %v2301_v62 = vmul.f32 %v3056_v58, %v3054_v57 }
 0x897   : > { %v2302_v59 = vpack.c.bf16 %v2301_v62, %v2300_v60 }
 0x899   : > { %2827 = vmatpush3.bf16.msra.mxu0 %v2302_v59 }
 0x89c   : > { %2829 = vmatmul.mubr.msk.bf16.vlgmr.msra.gmra.mxu0 %vm1221_vm4, %v2972_v0 }
 0x95c   : > { %v2348_v36 = vpop.f32.mrf.mxu0 }
 0x95d   : > { %v2355_v39 = vadd.f32 %v2348_v36, %v2005_v11 }
 0x95e   : > { %v2830_v2 = vpop.f32.mrf.mxu0 }
 0x95f   : > { %v2370_v61 = vadd.f32 %v2363_v17, %v2355_v39 }
 0x960   : > { %v2351_v13 = vpop.f32.mrf.mxu0 }
 0x961   : > { %v2356_v16 = vadd.f32 %v2351_v13, %v2006_v5 }
 0x962   : > { %v2831_v33 = vpop.f32.mrf.mxu0 }
 0x963   : > { %v2371_v26 = vadd.f32 %v2368_v6, %v2356_v16 }
 0x965   : > { %v2373_v22 = vpack.c.bf16 %v2371_v26, %v2370_v61 }
 0x967   : > { %2833 = vmatpush3.bf16.msra.mxu1 %v2373_v22 }
 0x96a   : > { %2835 = vmatmul.mubr.msk.bf16.vlgmr.msra.gmra.mxu1 %vm1221_vm4, %v2372_v12 }
 0xa2a   : > { %v2417_v21 = vpop.f32.mrf.mxu1 }
 0xa2b   : > { %v2418_v42 = vadd.f32 %v2417_v21, %v2378_v63 }
 0xa2c   : > { %v2836_v4 = vpop.f32.mrf.mxu1 }
 0xa2d   : > { %2423 = vst [vmem:[%s455_s14] sm:$0xff] %v2418_v42 }
 0xa2e   : > { %v2420_v24 = vpop.f32.mrf.mxu1 }
 0xa2f   : > { %3076 = shalt.err (!%p3073_p7)
}
 0xa30   : > { %s3077_s27 = scalar_lea.hbm %s3776_s19, 128  ;;  %s3081_s12 = scalar_lea.hbm %s3869_s30, 512 }
 0xa31   : > { %p3078_p9 = scmp.ne.s32.totalorder %s3776_s19, %s3077_s27  ;;  %p3082_p12 = scmp.lt.s32.totalorder %s3776_s19, %s3869_s30 }
 0xa32   : > { %p3083_p13 = scmp.lt.s32.totalorder %s3081_s12, %s3077_s27 }
 0xa33   : > { %p3079_p10 = pnand %p3078_p9, %p3285_p3 }
 0xa34   : > { %p3084_p0 = por %p3083_p13, %p3082_p12 }
 0xa35   : > { %p3080_p11 = pneg %p3079_p10 }
 0xa37   : > { %p3085_p1 = pnand %p3084_p0, %p3080_p11 }
 0xa39   : > { %3088 = shalt.err (!%p3085_p1)
}
 0xa3a   : > { %2843 = dma.vmem_to_hbm [thread:$0]  (%p3285_p3), %s3778_s17, 128, %s3776_s19, %s2425_s24   ;;  %v2837_v8 = vpop.f32.mrf.mxu1 }
 0xa3b PF: > { %s3870_s14 = sld [smem:[#allocation10_spill]] }
 0xa3c   : > { %s3871_s29 = sld [smem:[#allocation6_spill]] }
 0xa41   : > { %p2849_p2 = scmp.ge.s32.totalorder %s3870_s14, 2 }
 0xa42   : > { %s2452_s25 = sand.u32 1, %s3871_s29  }
 0xa43   : > { %p2846_p4 = pnand %p2849_p2, %p3294_p8  ;;  %s2453_s15 = scalar_lea.sflag [#allocation4], %s2452_s25 }
 0xa45   : > { %p2847_p5 = pneg %p2846_p4 }
 0xa47   : > { %3122 = dma.done.wait (%p2847_p5), %s2453_s15, 128  }
 0xa48   : > { %3124 = vsyncadd (%p2847_p5), %s2453_s15, 4294967168  ;;  %s25_s28 = sadd.s32 1, %s3870_s14   ;;  %s3873_s16 = sld [smem:[#allocation7_spill]] }
 0xa49   : > { %p22_p6 = scmp.ge.s32.totalorder %s25_s28, 6   ;;  %s3874_s23 = sld [smem:[#allocation14_spill]] }
 0xa4a   : > { %s3875_s24 = sld [smem:[#allocation8_spill]]  ;;  %s3879_s21 = smov %s3131_s22 }
 0xa4b   : > { %s3876_s25 = sld [smem:[#allocation9_spill]]  ;;  %24 = sbr.rel (!%p22_p6) target bundleno = 7 (0x7), region = 118 }
 0xa4c   : > { %s3877_s26 = sld [smem:[#allocation11_spill]] }
 0xa4d   : > { %s3878_s27 = sld [smem:[#allocation12_spill]] }
 0xa4e   : > { %s3880_s22 = smov %s3873_s16 }
 0xa50   :  { %2458 = vsyncpa [#allocation4], 1 }
 0xa51   :  { %2460 = vsyncpa [#allocation4 + $0x1], 1 }

</bundles_post_ra>
